<compile_context>
chip_gen: v5e
topology: v5e:2x2
jax: 0.10.0
libtpu: 0.0.40
codegen_flags: <defaults>
</compile_context>

<pallas_src>
import math
import functools

import jax
import jax.numpy as jnp
from jax.experimental import pallas as pl
from jax.experimental.pallas import tpu as pltpu


MXU_DTYPE = jnp.bfloat16  # matmul operand dtype (f32 accumulation); set to jnp.float32 to
                          # reproduce the PyTorch reference bit-for-bit at the MXU inputs.


# ----------------------------------------------------------------------------
# Fused kernel: last CrossAttentionBlock + module-level fc_out, all heads at once.
# Inputs are head-major (N, H, L, E); rows flatten to (N*H*L, E) for dense matmuls.
# ----------------------------------------------------------------------------
def fused_block_kernel(x_ref, e_ref, wvk_ref, bvk_ref, wq_ref, bq_ref, ep_ref,
                       wo_ref, bo_ref, w1_ref, b1_ref, w2_ref, b2_ref, bn_ref,
                       wfc_ref, bfc_ref, out_ref):
    f32 = jnp.float32
    N, H, Lq, E = x_ref.shape
    Lvk = e_ref.shape[2]
    B = N * H
    scale = 1.0 / math.sqrt(float(E))
    eps = 1e-5
    inv_count = 1.0 / float(N * E)           # BatchNorm stats per (h, q) channel over (N, E)

    def mm(a, w_ref, b_ref):
        # rows @ (E, F) + bias: bf16 operands on the MXU, f32 accumulation.
        return (jnp.dot(a.astype(MXU_DTYPE), w_ref[...].astype(MXU_DTYPE),
                        preferred_element_type=f32) + b_ref[...])

    xf = x_ref[...].reshape(B * Lq, E)        # rows ordered (n, h, q)
    ef = e_ref[...].reshape(B * Lvk, E)

    # ---- projections: merged V|K weight (E, 2E) on e, Q weight on x ----
    vk = mm(ef, wvk_ref, bvk_ref)             # (B*Lvk, 2E)
    values_f = vk[:, :E]
    keys_f = vk[:, E:]
    queries_f = mm(xf, wq_ref, bq_ref)        # (B*Lq, E)

    values = values_f.reshape(B, Lvk, E)
    keys = keys_f.reshape(B, Lvk, E)
    queries = queries_f.reshape(B, Lq, E)

    # ---- relative-embedding scores: QE = V @ Ep^T  (Ep per head, shared over batch;
    #      the reference really uses the VALUE projection here) ----
    ep_b = jnp.broadcast_to(ep_ref[...][None], (N, H, Lq, E)).reshape(B, Lq, E)
    qe = jnp.einsum('bkd,bqd->bkq', values.astype(MXU_DTYPE), ep_b.astype(MXU_DTYPE),
                    preferred_element_type=f32)             # (B, Lvk, Lq)

    # ---- masked, scaled softmax of Q.K^T ----
    qk = jnp.einsum('bqd,bkd->bqk', queries.astype(MXU_DTYPE), keys.astype(MXU_DTYPE),
                    preferred_element_type=f32)             # (B, Lq, Lvk)
    qi = jax.lax.broadcasted_iota(jnp.int32, (Lq, Lvk), 0)
    ki = jax.lax.broadcasted_iota(jnp.int32, (Lq, Lvk), 1)
    keep = ki > qi          # reference: masked_fill(mask == 0, -1e20), mask = triu(., 1)
    logits = jnp.where(keep, qk, jnp.float32(-1e20)) * scale  # scale AFTER fill, as in torch
    m = jnp.max(logits, axis=-1, keepdims=True)
    p = jnp.exp(logits - m)
    probs = p / jnp.sum(p, axis=-1, keepdims=True)

    # ---- _mask_positions + _skew, closed form (requires Lq == Lvk):
    #      S[b, q, k] = QE[b, q, Lq-1-q+k] for k <= q, else 0.
    # TODO(synk): pltpu.roll(shift=1, stride=1) would move this shear to the XLU, but a
    # cyclic lane rotate over an 8-wide (sub-128) minor dim is not reliably lowerable, so we
    # keep the guaranteed-to-lower unrolled select (tiny: Lq iterations over ~4 vregs).
    diff = qi - ki
    s_mat = jnp.zeros((B, Lq, Lvk), f32)
    for r in range(Lq):                                      # static, tiny unroll
        col = qe[:, :, Lq - 1 - r:Lq - r]                    # (B, Lvk, 1) static lane slice
        s_mat = s_mat + jnp.where(diff == r, col, jnp.float32(0.0))

    attn = probs + s_mat                                     # reference adds S post-softmax

    # ---- attention output, attention-level fc_out, residual with x ----
    z = jnp.einsum('bqk,bke->bqe', attn.astype(MXU_DTYPE), values.astype(MXU_DTYPE),
                   preferred_element_type=f32)
    zf = mm(z.reshape(B * Lq, E), wo_ref, bo_ref)
    h = (zf + xf).reshape(N, H, Lq, E)

    # ---- BatchNorm1d(seq*heads, track_running_stats=False): channels = (q, h) position,
    #      biased variance over (batch, embed); affine params packed per head as (H, Lq, 4).
    bn = bn_ref[...]
    g2, be2 = bn[..., 0:1], bn[..., 1:2]
    g3, be3 = bn[..., 2:3], bn[..., 3:4]

    def batch_norm(v4, gamma, beta):
        srow = jnp.sum(v4, axis=3, keepdims=True)            # (N, H, Lq, 1)
        qrow = jnp.sum(v4 * v4, axis=3, keepdims=True)
        mean = jnp.sum(srow, axis=0, keepdims=True) * inv_count
        msq = jnp.sum(qrow, axis=0, keepdims=True) * inv_count
        var = jnp.maximum(msq - mean * mean, 0.0)
        inv = gamma * jax.lax.rsqrt(var + eps)               # rsqrt rides the EUP slot
        return (v4 - mean) * inv + beta

    xn = batch_norm(h, g2, be2)
    xnf = xn.reshape(B * Lq, E)

    # ---- feed-forward: Linear -> LeakyReLU(0.01) -> Linear, residual, norm3 ----
    h1 = mm(xnf, w1_ref, b1_ref)
    h1 = jnp.where(h1 > 0, h1, jnp.float32(0.01) * h1)
    h2 = mm(h1, w2_ref, b2_ref)
    out = batch_norm((h2 + xnf).reshape(N, H, Lq, E), g3, be3)

    # ---- module-level fc_out fused into the same kernel ----
    of = mm(out.reshape(B * Lq, E), wfc_ref, bfc_ref)
    out_ref[...] = of.reshape(N, H, Lq, E)


# ----------------------------------------------------------------------------
# Wrapper: layout glue + single pallas_call.
# ----------------------------------------------------------------------------
def cross_attention_module(x, e, params, seq_len_q, seq_len_vk, heads):
    N, _, E = x.shape
    # TODO(synk): the in-kernel closed-form skew assumes seq_len_q == seq_len_vk (true for
    # this module's temporal/spatial configuration).
    assert seq_len_q == seq_len_vk, "in-kernel skew requires seq_len_q == seq_len_vk"

    # Reference semantics: every layer consumes the ORIGINAL (x, e), `out` is overwritten,
    # BatchNorm keeps no running stats -> only the last layer is observable.  Run it alone.
    lp = params["layers"][-1]

    # head-major glue: (N, seq*heads, E) -> (N, heads, seq, E); one tiny XLA copy each way.
    x_hm = x.reshape(N, seq_len_q, heads, E).transpose(0, 2, 1, 3)
    e_hm = e.reshape(N, seq_len_vk, heads, E).transpose(0, 2, 1, 3)

    out_hm = pl.pallas_call(
        fused_block_kernel,
        out_shape=jax.ShapeDtypeStruct((N, heads, seq_len_q, E), jnp.float32),
        # no grid / BlockSpecs: single invocation, every operand resident in VMEM.
    )(x_hm, e_hm, lp["wvk"], lp["bvk"], lp["wq"], lp["bq"], lp["ep"],
      lp["wo"], lp["bo"], lp["w1"], lp["b1"], lp["w2"], lp["b2"], lp["bn"],
      params["w_fc"], params["b_fc"])

    # back to the reference layout (N, seq_len_q*heads, E), rows ordered (q, h)
    return out_hm.transpose(0, 2, 1, 3).reshape(N, seq_len_q * heads, E)


# ----------------------------------------------------------------------------
# Deterministic parameter initialization (shapes from the module __init__)
# ----------------------------------------------------------------------------
def init_params(key, E, heads, Lq, Lvk, num_layers):
    def linear(k, fan_in, fan_out):
        k1, k2 = jax.random.split(k)
        bound = 1.0 / math.sqrt(float(fan_in))
        w = jax.random.uniform(k1, (fan_in, fan_out), jnp.float32, -bound, bound)
        b = jax.random.uniform(k2, (1, fan_out), jnp.float32, -bound, bound)
        return w, b

    keys = jax.random.split(key, num_layers + 1)
    layers = []
    for lk in keys[:num_layers]:
        ks = jax.random.split(lk, 7)
        wv, bv = linear(ks[0], E, E)
        wk, bk = linear(ks[1], E, E)
        wq, bq = linear(ks[2], E, E)
        ep = jax.random.normal(ks[3], (heads, Lq, E), jnp.float32)   # relative embedding
        wo, bo = linear(ks[4], E, E)
        w1, b1 = linear(ks[5], E, E)
        w2, b2 = linear(ks[6], E, E)
        # BatchNorm affine params packed per (head, q) channel: [gamma2, beta2, gamma3, beta3]
        # (reference channel index c = q*heads + h maps to bn[h, q, :]).
        gamma = jnp.ones((heads, Lq), jnp.float32)
        beta = jnp.zeros((heads, Lq), jnp.float32)
        bn = jnp.stack([gamma, beta, gamma, beta], axis=-1)          # (H, Lq, 4)
        layers.append(dict(wvk=jnp.concatenate([wv, wk], axis=1),    # merged V|K: (E, 2E)
                           bvk=jnp.concatenate([bv, bk], axis=1),
                           wq=wq, bq=bq, ep=ep,
                           wo=wo, bo=bo, w1=w1, b1=b1, w2=w2, b2=b2, bn=bn))
    w_fc, b_fc = linear(keys[-1], E, E)
    return dict(layers=layers, w_fc=w_fc, b_fc=b_fc)


if __name__ == "__main__":
    # module='temporal', rel_emb=True configuration
    embed_size = 32
    heads = 2
    seq_len_q = 8
    seq_len_vk = 8
    num_layers = 2
    batch = 2

    key = jax.random.PRNGKey(0)
    kx, ke, kp = jax.random.split(key, 3)
    # inputs in the reference layout (N, seq*heads, embed)
    x = jax.random.normal(kx, (batch, seq_len_q * heads, embed_size), jnp.float32)
    e = jax.random.normal(ke, (batch, seq_len_vk * heads, embed_size), jnp.float32)
    params = init_params(kp, embed_size, heads, seq_len_q, seq_len_vk, num_layers)

    fwd = jax.jit(functools.partial(cross_attention_module, seq_len_q=seq_len_q,
                                    seq_len_vk=seq_len_vk, heads=heads))
    out = jax.block_until_ready(fwd(x, e, params))

    assert out.shape == (batch, seq_len_q * heads, embed_size), out.shape
    assert bool(jnp.all(jnp.isfinite(out)))
    print("KERNEL_OK")
</pallas_src>

<mosaic_0001>
module attributes {stable_mosaic.version = 11 : i64} {
  func.func @fused_block_kernel(%arg0: memref<2x2x8x32xf32, #tpu.memory_space<vmem>>, %arg1: memref<2x2x8x32xf32, #tpu.memory_space<vmem>>, %arg2: memref<32x64xf32, #tpu.memory_space<vmem>>, %arg3: memref<1x64xf32, #tpu.memory_space<vmem>>, %arg4: memref<32x32xf32, #tpu.memory_space<vmem>>, %arg5: memref<1x32xf32, #tpu.memory_space<vmem>>, %arg6: memref<2x8x32xf32, #tpu.memory_space<vmem>>, %arg7: memref<32x32xf32, #tpu.memory_space<vmem>>, %arg8: memref<1x32xf32, #tpu.memory_space<vmem>>, %arg9: memref<32x32xf32, #tpu.memory_space<vmem>>, %arg10: memref<1x32xf32, #tpu.memory_space<vmem>>, %arg11: memref<32x32xf32, #tpu.memory_space<vmem>>, %arg12: memref<1x32xf32, #tpu.memory_space<vmem>>, %arg13: memref<2x8x4xf32, #tpu.memory_space<vmem>>, %arg14: memref<32x32xf32, #tpu.memory_space<vmem>>, %arg15: memref<1x32xf32, #tpu.memory_space<vmem>>, %arg16: memref<2x2x8x32xf32, #tpu.memory_space<vmem>>) attributes {dimension_semantics = [], scalar_prefetch = 0 : i64, scratch_operands = 0 : i64, tpu.core_type = #tpu.core_type<tc>} {
    %c0 = arith.constant 0 : index
    %c0_0 = arith.constant 0 : index
    %c0_1 = arith.constant 0 : index
    %c0_2 = arith.constant 0 : index
    %0 = vector.load %arg0[%c0, %c0_0, %c0_1, %c0_2] : memref<2x2x8x32xf32, #tpu.memory_space<vmem>>, vector<2x2x8x32xf32>
    %1 = vector.shape_cast %0 : vector<2x2x8x32xf32> to vector<32x32xf32>
    %c0_3 = arith.constant 0 : index
    %c0_4 = arith.constant 0 : index
    %c0_5 = arith.constant 0 : index
    %c0_6 = arith.constant 0 : index
    %2 = vector.load %arg1[%c0_3, %c0_4, %c0_5, %c0_6] : memref<2x2x8x32xf32, #tpu.memory_space<vmem>>, vector<2x2x8x32xf32>
    %3 = vector.shape_cast %2 : vector<2x2x8x32xf32> to vector<32x32xf32>
    %4 = arith.truncf %3 : vector<32x32xf32> to vector<32x32xbf16>
    %c0_7 = arith.constant 0 : index
    %c0_8 = arith.constant 0 : index
    %5 = vector.load %arg2[%c0_7, %c0_8] : memref<32x64xf32, #tpu.memory_space<vmem>>, vector<32x64xf32>
    %6 = arith.truncf %5 : vector<32x64xf32> to vector<32x64xbf16>
    %cst = arith.constant dense<0.000000e+00> : vector<32x64xf32>
    %7 = tpu.matmul %4, %6, %cst {dimension_numbers = #tpu.dot_dimension_numbers<[1], [0], [0], [1], [0, 0, 1, 1], [], []>} : vector<32x32xbf16>, vector<32x64xbf16>, vector<32x64xf32> -> vector<32x64xf32>
    %c0_9 = arith.constant 0 : index
    %c0_10 = arith.constant 0 : index
    %8 = vector.load %arg3[%c0_9, %c0_10] : memref<1x64xf32, #tpu.memory_space<vmem>>, vector<1x64xf32>
    %9 = vector.broadcast %8 : vector<1x64xf32> to vector<32x64xf32>
    %10 = arith.addf %7, %9 : vector<32x64xf32>
    %11 = vector.extract_strided_slice %10 {offsets = [0, 0], sizes = [32, 32], strides = [1, 1]} : vector<32x64xf32> to vector<32x32xf32>
    %12 = vector.extract_strided_slice %10 {offsets = [0, 32], sizes = [32, 32], strides = [1, 1]} : vector<32x64xf32> to vector<32x32xf32>
    %13 = arith.truncf %1 : vector<32x32xf32> to vector<32x32xbf16>
    %c0_11 = arith.constant 0 : index
    %c0_12 = arith.constant 0 : index
    %14 = vector.load %arg4[%c0_11, %c0_12] : memref<32x32xf32, #tpu.memory_space<vmem>>, vector<32x32xf32>
    %15 = arith.truncf %14 : vector<32x32xf32> to vector<32x32xbf16>
    %cst_13 = arith.constant dense<0.000000e+00> : vector<32x32xf32>
    %16 = tpu.matmul %13, %15, %cst_13 {dimension_numbers = #tpu.dot_dimension_numbers<[1], [0], [0], [1], [0, 0, 1, 1], [], []>} : vector<32x32xbf16>, vector<32x32xbf16>, vector<32x32xf32> -> vector<32x32xf32>
    %c0_14 = arith.constant 0 : index
    %c0_15 = arith.constant 0 : index
    %17 = vector.load %arg5[%c0_14, %c0_15] : memref<1x32xf32, #tpu.memory_space<vmem>>, vector<1x32xf32>
    %18 = vector.broadcast %17 : vector<1x32xf32> to vector<32x32xf32>
    %19 = arith.addf %16, %18 : vector<32x32xf32>
    %20 = vector.shape_cast %11 : vector<32x32xf32> to vector<4x8x32xf32>
    %21 = vector.shape_cast %12 : vector<32x32xf32> to vector<4x8x32xf32>
    %22 = vector.shape_cast %19 : vector<32x32xf32> to vector<4x8x32xf32>
    %c0_16 = arith.constant 0 : index
    %c0_17 = arith.constant 0 : index
    %c0_18 = arith.constant 0 : index
    %23 = vector.load %arg6[%c0_16, %c0_17, %c0_18] : memref<2x8x32xf32, #tpu.memory_space<vmem>>, vector<2x8x32xf32>
    %24 = vector.shape_cast %23 : vector<2x8x32xf32> to vector<1x2x8x32xf32>
    %25 = vector.shape_cast %24 : vector<1x2x8x32xf32> to vector<1x2x8x32xf32>
    %26 = vector.broadcast %25 : vector<1x2x8x32xf32> to vector<2x2x8x32xf32>
    %27 = vector.shape_cast %26 : vector<2x2x8x32xf32> to vector<4x8x32xf32>
    %28 = arith.truncf %20 : vector<4x8x32xf32> to vector<4x8x32xbf16>
    %29 = arith.truncf %27 : vector<4x8x32xf32> to vector<4x8x32xbf16>
    "tpu.trace_start"() <{level = 10 : i32, message = "bkd,bqd->bkq"}> : () -> ()
    %cst_19 = arith.constant dense<0.000000e+00> : vector<4x8x8xf32>
    %30 = tpu.matmul %28, %29, %cst_19 {dimension_numbers = #tpu.dot_dimension_numbers<[2], [2], [1], [1], [0, 0, 0, 1, 1, 1], [0], [0]>} : vector<4x8x32xbf16>, vector<4x8x32xbf16>, vector<4x8x8xf32> -> vector<4x8x8xf32>
    "tpu.trace_stop"() : () -> ()
    %31 = arith.truncf %22 : vector<4x8x32xf32> to vector<4x8x32xbf16>
    %32 = arith.truncf %21 : vector<4x8x32xf32> to vector<4x8x32xbf16>
    "tpu.trace_start"() <{level = 10 : i32, message = "bqd,bkd->bqk"}> : () -> ()
    %cst_20 = arith.constant dense<0.000000e+00> : vector<4x8x8xf32>
    %33 = tpu.matmul %31, %32, %cst_20 {dimension_numbers = #tpu.dot_dimension_numbers<[2], [2], [1], [1], [0, 0, 0, 1, 1, 1], [0], [0]>} : vector<4x8x32xbf16>, vector<4x8x32xbf16>, vector<4x8x8xf32> -> vector<4x8x8xf32>
    "tpu.trace_stop"() : () -> ()
    %34 = tpu.iota {dimensions = array<i32: 0>} : vector<8x8xi32>
    %35 = tpu.iota {dimensions = array<i32: 1>} : vector<8x8xi32>
    %36 = arith.cmpi sgt, %35, %34 : vector<8x8xi32>
    %cst_21 = arith.constant -1.000000e+20 : f32
    %37 = vector.shape_cast %36 : vector<8x8xi1> to vector<1x8x8xi1>
    %38 = vector.broadcast %37 : vector<1x8x8xi1> to vector<4x8x8xi1>
    %39 = vector.broadcast %cst_21 : f32 to vector<4x8x8xf32>
    %40 = arith.select %38, %33, %39 : vector<4x8x8xi1>, vector<4x8x8xf32>
    %cst_22 = arith.constant 0.176776692 : f32
    %41 = vector.broadcast %cst_22 : f32 to vector<4x8x8xf32>
    %42 = arith.mulf %40, %41 : vector<4x8x8xf32>
    %cst_23 = arith.constant dense<0xFF800000> : vector<4x8xf32>
    %43 = vector.multi_reduction <maximumf>, %42, %cst_23 [2] : vector<4x8x8xf32> to vector<4x8xf32>
    %44 = vector.shape_cast %43 : vector<4x8xf32> to vector<4x8x1xf32>
    %45 = vector.broadcast %44 : vector<4x8x1xf32> to vector<4x8x8xf32>
    %46 = arith.subf %42, %45 : vector<4x8x8xf32>
    %47 = math.exp %46 : vector<4x8x8xf32>
    %cst_24 = arith.constant dense<0.000000e+00> : vector<4x8xf32>
    %48 = vector.multi_reduction <add>, %47, %cst_24 [2] : vector<4x8x8xf32> to vector<4x8xf32>
    %49 = vector.shape_cast %48 : vector<4x8xf32> to vector<4x8x1xf32>
    %50 = vector.broadcast %49 : vector<4x8x1xf32> to vector<4x8x8xf32>
    %51 = arith.divf %47, %50 : vector<4x8x8xf32>
    %52 = arith.subi %34, %35 : vector<8x8xi32>
    %cst_25 = arith.constant 0.000000e+00 : f32
    %53 = vector.broadcast %cst_25 : f32 to vector<4x8x8xf32>
    %54 = vector.extract_strided_slice %30 {offsets = [0, 0, 7], sizes = [4, 8, 1], strides = [1, 1, 1]} : vector<4x8x8xf32> to vector<4x8x1xf32>
    %c0_i32 = arith.constant 0 : i32
    %55 = vector.broadcast %c0_i32 : i32 to vector<8x8xi32>
    %56 = arith.cmpi eq, %52, %55 : vector<8x8xi32>
    %cst_26 = arith.constant 0.000000e+00 : f32
    %57 = vector.shape_cast %56 : vector<8x8xi1> to vector<1x8x8xi1>
    %58 = vector.broadcast %57 : vector<1x8x8xi1> to vector<4x8x8xi1>
    %59 = vector.shape_cast %54 : vector<4x8x1xf32> to vector<4x8x1xf32>
    %60 = vector.broadcast %59 : vector<4x8x1xf32> to vector<4x8x8xf32>
    %61 = vector.broadcast %cst_26 : f32 to vector<4x8x8xf32>
    %62 = arith.select %58, %60, %61 : vector<4x8x8xi1>, vector<4x8x8xf32>
    %63 = arith.addf %53, %62 : vector<4x8x8xf32>
    %64 = vector.extract_strided_slice %30 {offsets = [0, 0, 6], sizes = [4, 8, 1], strides = [1, 1, 1]} : vector<4x8x8xf32> to vector<4x8x1xf32>
    %c1_i32 = arith.constant 1 : i32
    %65 = vector.broadcast %c1_i32 : i32 to vector<8x8xi32>
    %66 = arith.cmpi eq, %52, %65 : vector<8x8xi32>
    %cst_27 = arith.constant 0.000000e+00 : f32
    %67 = vector.shape_cast %66 : vector<8x8xi1> to vector<1x8x8xi1>
    %68 = vector.broadcast %67 : vector<1x8x8xi1> to vector<4x8x8xi1>
    %69 = vector.shape_cast %64 : vector<4x8x1xf32> to vector<4x8x1xf32>
    %70 = vector.broadcast %69 : vector<4x8x1xf32> to vector<4x8x8xf32>
    %71 = vector.broadcast %cst_27 : f32 to vector<4x8x8xf32>
    %72 = arith.select %68, %70, %71 : vector<4x8x8xi1>, vector<4x8x8xf32>
    %73 = arith.addf %63, %72 : vector<4x8x8xf32>
    %74 = vector.extract_strided_slice %30 {offsets = [0, 0, 5], sizes = [4, 8, 1], strides = [1, 1, 1]} : vector<4x8x8xf32> to vector<4x8x1xf32>
    %c2_i32 = arith.constant 2 : i32
    %75 = vector.broadcast %c2_i32 : i32 to vector<8x8xi32>
    %76 = arith.cmpi eq, %52, %75 : vector<8x8xi32>
    %cst_28 = arith.constant 0.000000e+00 : f32
    %77 = vector.shape_cast %76 : vector<8x8xi1> to vector<1x8x8xi1>
    %78 = vector.broadcast %77 : vector<1x8x8xi1> to vector<4x8x8xi1>
    %79 = vector.shape_cast %74 : vector<4x8x1xf32> to vector<4x8x1xf32>
    %80 = vector.broadcast %79 : vector<4x8x1xf32> to vector<4x8x8xf32>
    %81 = vector.broadcast %cst_28 : f32 to vector<4x8x8xf32>
    %82 = arith.select %78, %80, %81 : vector<4x8x8xi1>, vector<4x8x8xf32>
    %83 = arith.addf %73, %82 : vector<4x8x8xf32>
    %84 = vector.extract_strided_slice %30 {offsets = [0, 0, 4], sizes = [4, 8, 1], strides = [1, 1, 1]} : vector<4x8x8xf32> to vector<4x8x1xf32>
    %c3_i32 = arith.constant 3 : i32
    %85 = vector.broadcast %c3_i32 : i32 to vector<8x8xi32>
    %86 = arith.cmpi eq, %52, %85 : vector<8x8xi32>
    %cst_29 = arith.constant 0.000000e+00 : f32
    %87 = vector.shape_cast %86 : vector<8x8xi1> to vector<1x8x8xi1>
    %88 = vector.broadcast %87 : vector<1x8x8xi1> to vector<4x8x8xi1>
    %89 = vector.shape_cast %84 : vector<4x8x1xf32> to vector<4x8x1xf32>
    %90 = vector.broadcast %89 : vector<4x8x1xf32> to vector<4x8x8xf32>
    %91 = vector.broadcast %cst_29 : f32 to vector<4x8x8xf32>
    %92 = arith.select %88, %90, %91 : vector<4x8x8xi1>, vector<4x8x8xf32>
    %93 = arith.addf %83, %92 : vector<4x8x8xf32>
    %94 = vector.extract_strided_slice %30 {offsets = [0, 0, 3], sizes = [4, 8, 1], strides = [1, 1, 1]} : vector<4x8x8xf32> to vector<4x8x1xf32>
    %c4_i32 = arith.constant 4 : i32
    %95 = vector.broadcast %c4_i32 : i32 to vector<8x8xi32>
    %96 = arith.cmpi eq, %52, %95 : vector<8x8xi32>
    %cst_30 = arith.constant 0.000000e+00 : f32
    %97 = vector.shape_cast %96 : vector<8x8xi1> to vector<1x8x8xi1>
    %98 = vector.broadcast %97 : vector<1x8x8xi1> to vector<4x8x8xi1>
    %99 = vector.shape_cast %94 : vector<4x8x1xf32> to vector<4x8x1xf32>
    %100 = vector.broadcast %99 : vector<4x8x1xf32> to vector<4x8x8xf32>
    %101 = vector.broadcast %cst_30 : f32 to vector<4x8x8xf32>
    %102 = arith.select %98, %100, %101 : vector<4x8x8xi1>, vector<4x8x8xf32>
    %103 = arith.addf %93, %102 : vector<4x8x8xf32>
    %104 = vector.extract_strided_slice %30 {offsets = [0, 0, 2], sizes = [4, 8, 1], strides = [1, 1, 1]} : vector<4x8x8xf32> to vector<4x8x1xf32>
    %c5_i32 = arith.constant 5 : i32
    %105 = vector.broadcast %c5_i32 : i32 to vector<8x8xi32>
    %106 = arith.cmpi eq, %52, %105 : vector<8x8xi32>
    %cst_31 = arith.constant 0.000000e+00 : f32
    %107 = vector.shape_cast %106 : vector<8x8xi1> to vector<1x8x8xi1>
    %108 = vector.broadcast %107 : vector<1x8x8xi1> to vector<4x8x8xi1>
    %109 = vector.shape_cast %104 : vector<4x8x1xf32> to vector<4x8x1xf32>
    %110 = vector.broadcast %109 : vector<4x8x1xf32> to vector<4x8x8xf32>
    %111 = vector.broadcast %cst_31 : f32 to vector<4x8x8xf32>
    %112 = arith.select %108, %110, %111 : vector<4x8x8xi1>, vector<4x8x8xf32>
    %113 = arith.addf %103, %112 : vector<4x8x8xf32>
    %114 = vector.extract_strided_slice %30 {offsets = [0, 0, 1], sizes = [4, 8, 1], strides = [1, 1, 1]} : vector<4x8x8xf32> to vector<4x8x1xf32>
    %c6_i32 = arith.constant 6 : i32
    %115 = vector.broadcast %c6_i32 : i32 to vector<8x8xi32>
    %116 = arith.cmpi eq, %52, %115 : vector<8x8xi32>
    %cst_32 = arith.constant 0.000000e+00 : f32
    %117 = vector.shape_cast %116 : vector<8x8xi1> to vector<1x8x8xi1>
    %118 = vector.broadcast %117 : vector<1x8x8xi1> to vector<4x8x8xi1>
    %119 = vector.shape_cast %114 : vector<4x8x1xf32> to vector<4x8x1xf32>
    %120 = vector.broadcast %119 : vector<4x8x1xf32> to vector<4x8x8xf32>
    %121 = vector.broadcast %cst_32 : f32 to vector<4x8x8xf32>
    %122 = arith.select %118, %120, %121 : vector<4x8x8xi1>, vector<4x8x8xf32>
    %123 = arith.addf %113, %122 : vector<4x8x8xf32>
    %124 = vector.extract_strided_slice %30 {offsets = [0, 0, 0], sizes = [4, 8, 1], strides = [1, 1, 1]} : vector<4x8x8xf32> to vector<4x8x1xf32>
    %c7_i32 = arith.constant 7 : i32
    %125 = vector.broadcast %c7_i32 : i32 to vector<8x8xi32>
    %126 = arith.cmpi eq, %52, %125 : vector<8x8xi32>
    %cst_33 = arith.constant 0.000000e+00 : f32
    %127 = vector.shape_cast %126 : vector<8x8xi1> to vector<1x8x8xi1>
    %128 = vector.broadcast %127 : vector<1x8x8xi1> to vector<4x8x8xi1>
    %129 = vector.shape_cast %124 : vector<4x8x1xf32> to vector<4x8x1xf32>
    %130 = vector.broadcast %129 : vector<4x8x1xf32> to vector<4x8x8xf32>
    %131 = vector.broadcast %cst_33 : f32 to vector<4x8x8xf32>
    %132 = arith.select %128, %130, %131 : vector<4x8x8xi1>, vector<4x8x8xf32>
    %133 = arith.addf %123, %132 : vector<4x8x8xf32>
    %134 = arith.addf %51, %133 : vector<4x8x8xf32>
    %135 = arith.truncf %134 : vector<4x8x8xf32> to vector<4x8x8xbf16>
    %136 = arith.truncf %20 : vector<4x8x32xf32> to vector<4x8x32xbf16>
    "tpu.trace_start"() <{level = 10 : i32, message = "bqk,bke->bqe"}> : () -> ()
    %cst_34 = arith.constant dense<0.000000e+00> : vector<4x8x32xf32>
    %137 = tpu.matmul %135, %136, %cst_34 {dimension_numbers = #tpu.dot_dimension_numbers<[2], [1], [1], [2], [0, 0, 0, 1, 1, 2], [0], [0]>} : vector<4x8x8xbf16>, vector<4x8x32xbf16>, vector<4x8x32xf32> -> vector<4x8x32xf32>
    "tpu.trace_stop"() : () -> ()
    %138 = vector.shape_cast %137 : vector<4x8x32xf32> to vector<32x32xf32>
    %139 = arith.truncf %138 : vector<32x32xf32> to vector<32x32xbf16>
    %c0_35 = arith.constant 0 : index
    %c0_36 = arith.constant 0 : index
    %140 = vector.load %arg7[%c0_35, %c0_36] : memref<32x32xf32, #tpu.memory_space<vmem>>, vector<32x32xf32>
    %141 = arith.truncf %140 : vector<32x32xf32> to vector<32x32xbf16>
    %cst_37 = arith.constant dense<0.000000e+00> : vector<32x32xf32>
    %142 = tpu.matmul %139, %141, %cst_37 {dimension_numbers = #tpu.dot_dimension_numbers<[1], [0], [0], [1], [0, 0, 1, 1], [], []>} : vector<32x32xbf16>, vector<32x32xbf16>, vector<32x32xf32> -> vector<32x32xf32>
    %c0_38 = arith.constant 0 : index
    %c0_39 = arith.constant 0 : index
    %143 = vector.load %arg8[%c0_38, %c0_39] : memref<1x32xf32, #tpu.memory_space<vmem>>, vector<1x32xf32>
    %144 = vector.broadcast %143 : vector<1x32xf32> to vector<32x32xf32>
    %145 = arith.addf %142, %144 : vector<32x32xf32>
    %146 = arith.addf %145, %1 : vector<32x32xf32>
    %147 = vector.shape_cast %146 : vector<32x32xf32> to vector<2x2x8x32xf32>
    %c0_40 = arith.constant 0 : index
    %c0_41 = arith.constant 0 : index
    %c0_42 = arith.constant 0 : index
    %148 = vector.load %arg13[%c0_40, %c0_41, %c0_42] : memref<2x8x4xf32, #tpu.memory_space<vmem>>, vector<2x8x4xf32>
    %149 = vector.extract_strided_slice %148 {offsets = [0, 0, 0], sizes = [2, 8, 1], strides = [1, 1, 1]} : vector<2x8x4xf32> to vector<2x8x1xf32>
    %150 = vector.extract_strided_slice %148 {offsets = [0, 0, 1], sizes = [2, 8, 1], strides = [1, 1, 1]} : vector<2x8x4xf32> to vector<2x8x1xf32>
    %151 = vector.extract_strided_slice %148 {offsets = [0, 0, 2], sizes = [2, 8, 1], strides = [1, 1, 1]} : vector<2x8x4xf32> to vector<2x8x1xf32>
    %152 = vector.extract_strided_slice %148 {offsets = [0, 0, 3], sizes = [2, 8, 1], strides = [1, 1, 1]} : vector<2x8x4xf32> to vector<2x8x1xf32>
    %cst_43 = arith.constant dense<0.000000e+00> : vector<2x2x8xf32>
    %153 = vector.multi_reduction <add>, %147, %cst_43 [3] : vector<2x2x8x32xf32> to vector<2x2x8xf32>
    %154 = vector.shape_cast %153 : vector<2x2x8xf32> to vector<2x2x8x1xf32>
    %155 = arith.mulf %147, %147 : vector<2x2x8x32xf32>
    %cst_44 = arith.constant dense<0.000000e+00> : vector<2x2x8xf32>
    %156 = vector.multi_reduction <add>, %155, %cst_44 [3] : vector<2x2x8x32xf32> to vector<2x2x8xf32>
    %157 = vector.shape_cast %156 : vector<2x2x8xf32> to vector<2x2x8x1xf32>
    %cst_45 = arith.constant dense<0.000000e+00> : vector<2x8x1xf32>
    %158 = vector.multi_reduction <add>, %154, %cst_45 [0] : vector<2x2x8x1xf32> to vector<2x8x1xf32>
    %159 = vector.shape_cast %158 : vector<2x8x1xf32> to vector<1x2x8x1xf32>
    %cst_46 = arith.constant 1.562500e-02 : f32
    %160 = vector.broadcast %cst_46 : f32 to vector<1x2x8x1xf32>
    %161 = arith.mulf %159, %160 : vector<1x2x8x1xf32>
    %cst_47 = arith.constant dense<0.000000e+00> : vector<2x8x1xf32>
    %162 = vector.multi_reduction <add>, %157, %cst_47 [0] : vector<2x2x8x1xf32> to vector<2x8x1xf32>
    %163 = vector.shape_cast %162 : vector<2x8x1xf32> to vector<1x2x8x1xf32>
    %cst_48 = arith.constant 1.562500e-02 : f32
    %164 = vector.broadcast %cst_48 : f32 to vector<1x2x8x1xf32>
    %165 = arith.mulf %163, %164 : vector<1x2x8x1xf32>
    %166 = arith.mulf %161, %161 : vector<1x2x8x1xf32>
    %167 = arith.subf %165, %166 : vector<1x2x8x1xf32>
    %cst_49 = arith.constant 0.000000e+00 : f32
    %168 = vector.broadcast %cst_49 : f32 to vector<1x2x8x1xf32>
    %169 = arith.maximumf %167, %168 : vector<1x2x8x1xf32>
    %cst_50 = arith.constant 9.99999974E-6 : f32
    %170 = vector.broadcast %cst_50 : f32 to vector<1x2x8x1xf32>
    %171 = arith.addf %169, %170 : vector<1x2x8x1xf32>
    %172 = math.rsqrt %171 : vector<1x2x8x1xf32>
    %173 = vector.shape_cast %149 : vector<2x8x1xf32> to vector<1x2x8x1xf32>
    %174 = arith.mulf %173, %172 : vector<1x2x8x1xf32>
    %175 = vector.broadcast %161 : vector<1x2x8x1xf32> to vector<2x2x8x32xf32>
    %176 = arith.subf %147, %175 : vector<2x2x8x32xf32>
    %177 = vector.broadcast %174 : vector<1x2x8x1xf32> to vector<2x2x8x32xf32>
    %178 = arith.mulf %176, %177 : vector<2x2x8x32xf32>
    %179 = vector.shape_cast %150 : vector<2x8x1xf32> to vector<1x2x8x1xf32>
    %180 = vector.broadcast %179 : vector<1x2x8x1xf32> to vector<2x2x8x32xf32>
    %181 = arith.addf %178, %180 : vector<2x2x8x32xf32>
    %182 = vector.shape_cast %181 : vector<2x2x8x32xf32> to vector<32x32xf32>
    %183 = arith.truncf %182 : vector<32x32xf32> to vector<32x32xbf16>
    %c0_51 = arith.constant 0 : index
    %c0_52 = arith.constant 0 : index
    %184 = vector.load %arg9[%c0_51, %c0_52] : memref<32x32xf32, #tpu.memory_space<vmem>>, vector<32x32xf32>
    %185 = arith.truncf %184 : vector<32x32xf32> to vector<32x32xbf16>
    %cst_53 = arith.constant dense<0.000000e+00> : vector<32x32xf32>
    %186 = tpu.matmul %183, %185, %cst_53 {dimension_numbers = #tpu.dot_dimension_numbers<[1], [0], [0], [1], [0, 0, 1, 1], [], []>} : vector<32x32xbf16>, vector<32x32xbf16>, vector<32x32xf32> -> vector<32x32xf32>
    %c0_54 = arith.constant 0 : index
    %c0_55 = arith.constant 0 : index
    %187 = vector.load %arg10[%c0_54, %c0_55] : memref<1x32xf32, #tpu.memory_space<vmem>>, vector<1x32xf32>
    %188 = vector.broadcast %187 : vector<1x32xf32> to vector<32x32xf32>
    %189 = arith.addf %186, %188 : vector<32x32xf32>
    %cst_56 = arith.constant 0.000000e+00 : f32
    %190 = vector.broadcast %cst_56 : f32 to vector<32x32xf32>
    %191 = arith.cmpf ogt, %189, %190 : vector<32x32xf32>
    %cst_57 = arith.constant 0.00999999977 : f32
    %192 = vector.broadcast %cst_57 : f32 to vector<32x32xf32>
    %193 = arith.mulf %192, %189 : vector<32x32xf32>
    %194 = arith.select %191, %189, %193 : vector<32x32xi1>, vector<32x32xf32>
    %195 = arith.truncf %194 : vector<32x32xf32> to vector<32x32xbf16>
    %c0_58 = arith.constant 0 : index
    %c0_59 = arith.constant 0 : index
    %196 = vector.load %arg11[%c0_58, %c0_59] : memref<32x32xf32, #tpu.memory_space<vmem>>, vector<32x32xf32>
    %197 = arith.truncf %196 : vector<32x32xf32> to vector<32x32xbf16>
    %cst_60 = arith.constant dense<0.000000e+00> : vector<32x32xf32>
    %198 = tpu.matmul %195, %197, %cst_60 {dimension_numbers = #tpu.dot_dimension_numbers<[1], [0], [0], [1], [0, 0, 1, 1], [], []>} : vector<32x32xbf16>, vector<32x32xbf16>, vector<32x32xf32> -> vector<32x32xf32>
    %c0_61 = arith.constant 0 : index
    %c0_62 = arith.constant 0 : index
    %199 = vector.load %arg12[%c0_61, %c0_62] : memref<1x32xf32, #tpu.memory_space<vmem>>, vector<1x32xf32>
    %200 = vector.broadcast %199 : vector<1x32xf32> to vector<32x32xf32>
    %201 = arith.addf %198, %200 : vector<32x32xf32>
    %202 = arith.addf %201, %182 : vector<32x32xf32>
    %203 = vector.shape_cast %202 : vector<32x32xf32> to vector<2x2x8x32xf32>
    %cst_63 = arith.constant dense<0.000000e+00> : vector<2x2x8xf32>
    %204 = vector.multi_reduction <add>, %203, %cst_63 [3] : vector<2x2x8x32xf32> to vector<2x2x8xf32>
    %205 = vector.shape_cast %204 : vector<2x2x8xf32> to vector<2x2x8x1xf32>
    %206 = arith.mulf %203, %203 : vector<2x2x8x32xf32>
    %cst_64 = arith.constant dense<0.000000e+00> : vector<2x2x8xf32>
    %207 = vector.multi_reduction <add>, %206, %cst_64 [3] : vector<2x2x8x32xf32> to vector<2x2x8xf32>
    %208 = vector.shape_cast %207 : vector<2x2x8xf32> to vector<2x2x8x1xf32>
    %cst_65 = arith.constant dense<0.000000e+00> : vector<2x8x1xf32>
    %209 = vector.multi_reduction <add>, %205, %cst_65 [0] : vector<2x2x8x1xf32> to vector<2x8x1xf32>
    %210 = vector.shape_cast %209 : vector<2x8x1xf32> to vector<1x2x8x1xf32>
    %cst_66 = arith.constant 1.562500e-02 : f32
    %211 = vector.broadcast %cst_66 : f32 to vector<1x2x8x1xf32>
    %212 = arith.mulf %210, %211 : vector<1x2x8x1xf32>
    %cst_67 = arith.constant dense<0.000000e+00> : vector<2x8x1xf32>
    %213 = vector.multi_reduction <add>, %208, %cst_67 [0] : vector<2x2x8x1xf32> to vector<2x8x1xf32>
    %214 = vector.shape_cast %213 : vector<2x8x1xf32> to vector<1x2x8x1xf32>
    %cst_68 = arith.constant 1.562500e-02 : f32
    %215 = vector.broadcast %cst_68 : f32 to vector<1x2x8x1xf32>
    %216 = arith.mulf %214, %215 : vector<1x2x8x1xf32>
    %217 = arith.mulf %212, %212 : vector<1x2x8x1xf32>
    %218 = arith.subf %216, %217 : vector<1x2x8x1xf32>
    %cst_69 = arith.constant 0.000000e+00 : f32
    %219 = vector.broadcast %cst_69 : f32 to vector<1x2x8x1xf32>
    %220 = arith.maximumf %218, %219 : vector<1x2x8x1xf32>
    %cst_70 = arith.constant 9.99999974E-6 : f32
    %221 = vector.broadcast %cst_70 : f32 to vector<1x2x8x1xf32>
    %222 = arith.addf %220, %221 : vector<1x2x8x1xf32>
    %223 = math.rsqrt %222 : vector<1x2x8x1xf32>
    %224 = vector.shape_cast %151 : vector<2x8x1xf32> to vector<1x2x8x1xf32>
    %225 = arith.mulf %224, %223 : vector<1x2x8x1xf32>
    %226 = vector.broadcast %212 : vector<1x2x8x1xf32> to vector<2x2x8x32xf32>
    %227 = arith.subf %203, %226 : vector<2x2x8x32xf32>
    %228 = vector.broadcast %225 : vector<1x2x8x1xf32> to vector<2x2x8x32xf32>
    %229 = arith.mulf %227, %228 : vector<2x2x8x32xf32>
    %230 = vector.shape_cast %152 : vector<2x8x1xf32> to vector<1x2x8x1xf32>
    %231 = vector.broadcast %230 : vector<1x2x8x1xf32> to vector<2x2x8x32xf32>
    %232 = arith.addf %229, %231 : vector<2x2x8x32xf32>
    %233 = vector.shape_cast %232 : vector<2x2x8x32xf32> to vector<32x32xf32>
    %234 = arith.truncf %233 : vector<32x32xf32> to vector<32x32xbf16>
    %c0_71 = arith.constant 0 : index
    %c0_72 = arith.constant 0 : index
    %235 = vector.load %arg14[%c0_71, %c0_72] : memref<32x32xf32, #tpu.memory_space<vmem>>, vector<32x32xf32>
    %236 = arith.truncf %235 : vector<32x32xf32> to vector<32x32xbf16>
    %cst_73 = arith.constant dense<0.000000e+00> : vector<32x32xf32>
    %237 = tpu.matmul %234, %236, %cst_73 {dimension_numbers = #tpu.dot_dimension_numbers<[1], [0], [0], [1], [0, 0, 1, 1], [], []>} : vector<32x32xbf16>, vector<32x32xbf16>, vector<32x32xf32> -> vector<32x32xf32>
    %c0_74 = arith.constant 0 : index
    %c0_75 = arith.constant 0 : index
    %238 = vector.load %arg15[%c0_74, %c0_75] : memref<1x32xf32, #tpu.memory_space<vmem>>, vector<1x32xf32>
    %239 = vector.broadcast %238 : vector<1x32xf32> to vector<32x32xf32>
    %240 = arith.addf %237, %239 : vector<32x32xf32>
    %241 = vector.shape_cast %240 : vector<32x32xf32> to vector<2x2x8x32xf32>
    %c0_76 = arith.constant 0 : index
    %c0_77 = arith.constant 0 : index
    %c0_78 = arith.constant 0 : index
    %c0_79 = arith.constant 0 : index
    %242 = vector.load %arg16[%c0_76, %c0_77, %c0_78, %c0_79] : memref<2x2x8x32xf32, #tpu.memory_space<vmem>>, vector<2x2x8x32xf32>
    tpu.vector_store %arg16[%c0_76, %c0_77, %c0_78, %c0_79], %241 {strides = array<i32>} : memref<2x2x8x32xf32, #tpu.memory_space<vmem>>, vector<2x2x8x32xf32>,
    return
  }
}

</mosaic_0001>

<bundles_post_ra>
// kernel: cross_attention_module.1
= control target key start
LH: loop header
LB: loop body
LE: loop exit
PB: predicated region body
PF: predicated region fallthrough
CT: control target
= control target key end

     0   :  { %s2136_s0 = inlined_call_operand.vmem [shape: f32[2,2,8,32], index: 0, kind: input, shape index: {}]   ;;  %s2137_s1 = inlined_call_operand.vmem [shape: f32[2,2,8,32], index: 1, kind: input, shape index: {}]   ;;  %s2138_s2 = inlined_call_operand.vmem [shape: f32[32,64], index: 2, kind: input, shape index: {}]   ;;  %s2139_s3 = inlined_call_operand.vmem [shape: f32[1,64], index: 3, kind: input, shape index: {}]   ;;  %s2140_s4 = inlined_call_operand.vmem [shape: f32[32,32], index: 4, kind: input, shape index: {}]   ;;  %s2141_s5 = inlined_call_operand.hbm [shape: f32[1,32], index: 5, kind: input, shape index: {}]   ;;  %s2142_s6 = inlined_call_operand.hbm [shape: f32[2,8,32], index: 6, kind: input, shape index: {}]   ;;  %s2143_s7 = inlined_call_operand.vmem [shape: f32[32,32], index: 7, kind: input, shape index: {}]   ;;  %s2144_s8 = inlined_call_operand.hbm [shape: f32[1,32], index: 8, kind: input, shape index: {}]   ;;  %s2145_s9 = inlined_call_operand.vmem [shape: f32[32,32], index: 9, kind: input, shape index: {}]   ;;  %s2146_s10 = inlined_call_operand.hbm [shape: f32[1,32], index: 10, kind: input, shape index: {}]   ;;  %s2147_s11 = inlined_call_operand.hbm [shape: f32[32,32], index: 11, kind: input, shape index: {}]   ;;  %s2148_s12 = inlined_call_operand.hbm [shape: f32[1,32], index: 12, kind: input, shape index: {}]   ;;  %s2149_s13 = inlined_call_operand.vmem [shape: f32[2,8,4], index: 13, kind: input, shape index: {}]   ;;  %s2150_s14 = inlined_call_operand.hbm [shape: f32[32,32], index: 14, kind: input, shape index: {}]   ;;  %s2151_s15 = inlined_call_operand.hbm [shape: f32[1,32], index: 15, kind: input, shape index: {}]   ;;  %s2152_s16 = inlined_call_operand.vmem [shape: f32[2,2,8,32], index: 16, kind: output, shape index: {}]  }
   0x1   :  { %2154 = sst [smem:[#allocation20_spill]] %s2136_s0 }
   0x2   :  { %21 = vsyncpa [#allocation3], 0 }
   0x3   :  { %22 = vsyncpa [#allocation5], 0 }
   0x4   :  { %23 = vsyncpa [#allocation8], 0 }
   0x5   :  { %24 = vsyncpa [#allocation11], 0  ;;  %s51_s23 = sshll.u32 %s2142_s6, 4  ;;  %s52_s23 = int_to_ptr.hbm [resolvable:$true] %s51_s23 }
   0x6   :  { %25 = vsyncpa [#allocation14], 0  ;;  %s1534_s24 = smov [#allocation4]   ;;  %s80_s28 = sshll.u32 %s2146_s10, 4  ;;  %s81_s28 = int_to_ptr.hbm [resolvable:$true] %s80_s28 }
   0x7   :  { %s53_s25 = sshll.u32 %s1534_s24, 4  ;;  %s1535_s29 = smov 128   ;;  %s54_s25 = int_to_ptr.vmem [resolvable:$true] %s53_s25 }
   0x8   :  { %s1536_s30 = smov 8   ;;  %s1537_s0 = smov [#allocation7]  }
   0x9   :  { %59 = dma.hbm_to_vmem [thread:$0]  %s52_s23, 256, %s54_s25, [#allocation5], %s1535_s29, %s1535_s29, %s1536_s30  }
   0xa   :  { %s82_s17 = sshll.u32 %s1537_s0, 4  ;;  %s104_s19 = sshll.u32 %s2148_s12, 4  ;;  %s83_s17 = int_to_ptr.vmem [resolvable:$true] %s82_s17  ;;  %s105_s19 = int_to_ptr.hbm [resolvable:$true] %s104_s19 }
   0xb   :  { %85 = dma.hbm_to_vmem [thread:$0]  %s81_s28, 16, %s83_s17, [#allocation8]  }
   0xc   :  { %s41_s10 = sshll.u32 %s2141_s5, 4  ;;  %s1538_s22 = smov [#allocation10]   ;;  %s42_s10 = int_to_ptr.hbm [resolvable:$true] %s41_s10 }
   0xd   :  { %s106_s24 = sshll.u32 %s1538_s22, 4  ;;  %s1539_s23 = smov [#allocation2]   ;;  %s107_s24 = int_to_ptr.vmem [resolvable:$true] %s106_s24 }
   0xe   :  { %109 = dma.hbm_to_vmem [thread:$0]  %s105_s19, 16, %s107_s24, [#allocation11]  }
   0xf   :  { %s43_s25 = sshll.u32 %s1539_s23, 4  ;;  %s67_s0 = sshll.u32 %s2144_s8, 4  ;;  %s44_s25 = int_to_ptr.vmem [resolvable:$true] %s43_s25  ;;  %s68_s0 = int_to_ptr.hbm [resolvable:$true] %s67_s0 }
  0x10   :  { %46 = dma.hbm_to_vmem [thread:$0]  %s42_s10, 16, %s44_s25, [#allocation3]  }
  0x11   :  { %s90_s17 = sshll.u32 %s2147_s11, 4  ;;  %s1540_s18 = smov [#allocation6]   ;;  %s91_s17 = int_to_ptr.hbm [resolvable:$true] %s90_s17 }
  0x12   :  { %s69_s5 = sshll.u32 %s1540_s18, 4  ;;  %s1541_s6 = smov [#allocation9]   ;;  %s70_s5 = int_to_ptr.vmem [resolvable:$true] %s69_s5 }
  0x13   :  { %72 = dma.hbm_to_vmem [thread:$0]  %s68_s0, 16, %s70_s5, [#allocation5]  }
  0x14   :  { %s92_s19 = sshll.u32 %s1541_s6, 4  ;;  %s116_s22 = sshll.u32 %s2150_s14, 4  ;;  %s93_s19 = int_to_ptr.vmem [resolvable:$true] %s92_s19  ;;  %s117_s22 = int_to_ptr.hbm [resolvable:$true] %s116_s22 }
  0x15   :  { %98 = dma.hbm_to_vmem [thread:$0]  %s91_s17, 512, %s93_s19, [#allocation8], %s1535_s29, %s1535_s29, %s1536_s30  }
  0x16   :  { %s130_s11 = sshll.u32 %s2151_s15, 4  ;;  %s1542_s24 = smov [#allocation12]   ;;  %s131_s11 = int_to_ptr.hbm [resolvable:$true] %s130_s11 }
  0x17   :  { %s118_s23 = sshll.u32 %s1542_s24, 4  ;;  %s1543_s25 = smov [#allocation13]   ;;  %s119_s23 = int_to_ptr.vmem [resolvable:$true] %s118_s23 }
  0x18   :  { %124 = dma.hbm_to_vmem [thread:$0]  %s117_s22, 512, %s119_s23, [#allocation11], %s1535_s29, %s1535_s29, %s1536_s30  }
  0x19   :  { %s132_s14 = sshll.u32 %s1543_s25, 4  ;;  %s133_s14 = int_to_ptr.vmem [resolvable:$true] %s132_s14 }
  0x1a   :  { %135 = dma.hbm_to_vmem [thread:$0]  %s131_s11, 16, %s133_s14, [#allocation14]  }
  0x1b   :  { %1524 = dma.done.wait [#allocation3], 16  }
  0x1c   :  { %1525 = vsyncadd [#allocation3], 4294967280 }
  0x1d   :  { %1526 = dma.done.wait [#allocation5], 272  }
  0x1e   :  { %1527 = vsyncadd [#allocation5], 4294967024 }
  0x1f   :  { %1528 = dma.done.wait [#allocation8], 528  }
  0x20   :  { %1529 = vsyncadd [#allocation8], 4294966768 }
  0x21   :  { %1530 = dma.done.wait [#allocation11], 528  }
  0x22   :  { %1531 = vsyncadd [#allocation11], 4294966768 }
  0x23   :  { %1532 = dma.done.wait [#allocation14], 16  }
  0x24   :  { %1533 = vsyncadd [#allocation14], 4294967280  ;;  %v181_v0 = vld [vmem:[%s2138_s2 + $0x10] sm:$0xff]  ;;  %v182_v1 = vld [vmem:[%s2138_s2 + $0x18] sm:$0xff]  ;;  %vm189_vm0 = vcmask 261120   ;;  %s2155_s26 = sld [smem:[#allocation20_spill]] }
  0x25   :  { %v179_v2 = vld [vmem:[%s2138_s2] sm:$0xff]  ;;  %v184_v3 = vpack.c.bf16 %v182_v1, %v181_v0  ;;  %v180_v4 = vld [vmem:[%s2138_s2 + $0x8] sm:$0xff]  ;;  %v219_v7 = vld [vmem:[%s2140_s4 + $0x10] sm:$0xff]  ;;  %s1544_s18 = smov 96   ;;  %v1545_v51 = vmov 1   ;;  %v1546_v52 = vmov 6  }
  0x26   :  { %v173_v5 = vld [vmem:[%s2137_s1] sm:$0xff]  ;;  %v174_v6 = vld [vmem:[%s2137_s1 + $0x8] sm:$0xff]  ;;  %v183_v8 = vpack.c.bf16 %v180_v4, %v179_v2  ;;  %v220_v9 = vld [vmem:[%s2140_s4 + $0x18] sm:$0xff]  ;;  %1269 = vset.pattern.permute.xlu1 %v1545_v51  ;;  %1265 = vset.pattern.permute.xlu0 %v1546_v52  ;;  %v1547_v53 = vmov 7   ;;  %vm774_vm1 = vcmask 1043456   ;;  %vm445_vm8 = vcmask 64512  }
  0x27   :  { %202 = vmatpush.bf16.msra.mxu0 %v184_v3  ;;  %v252_v10 = vld [vmem:[#allocation4] sm:$0xff]  ;;  %v222_v12 = vpack.c.bf16 %v220_v9, %v219_v7  ;;  %v177_v15 = vpack.c.bf16 %v174_v6, %v173_v5  ;;  %v175_v18 = vld [vmem:[%s2137_s1 + $0x10] sm:$0xff]  ;;  %v176_v19 = vld [vmem:[%s2137_s1 + $0x18] sm:$0xff]  ;;  %1264 = vset.pattern.permute.xlu2 %v1547_v53 }
  0x28   :  { %v217_v11 = vld [vmem:[%s2140_s4] sm:$0xff]  ;;  %v258_v13 = vpack.c.bf16 %v252_v10, %v252_v10  ;;  %v218_v14 = vld [vmem:[%s2140_s4 + $0x8] sm:$0xff]  ;;  %v178_v20 = vpack.c.bf16 %v176_v19, %v175_v18 }
  0x29   :  { %239 = vmatpush.bf16.msra.mxu1 %v222_v12  ;;  %v221_v17 = vpack.c.bf16 %v218_v14, %v217_v11  ;;  %v253_v24 = vld [vmem:[#allocation4 + $0x8] sm:$0xff]  ;;  %v1302_v30 = vld [vmem:[%s2139_s3] ss:$0 sm:$0xff]  ;;  %v1548_v12 = vmov 2  }
  0x2a   :  { %v264_v16 = vsel %vm189_vm0, %v258_v13, 0  ;;  %v1713_v21 = vld [vmem:[%s2155_s26] sm:$0xff]  ;;  %v1718_v22 = vld [vmem:[%s2155_s26 + $0x8] sm:$0xff]  ;;  %v259_v25 = vpack.c.bf16 %v253_v24, %v253_v24  ;;  %v1727_v27 = vld [vmem:[%s2155_s26 + $0x10] sm:$0xff]  ;;  %v1549_v13 = vmov 5  }
  0x2b   :  { %203 = vmatpush.bf16.msra.mxu0 %v183_v8  ;;  %273 = vmatpush.bf16.xpose.msra.mxu2 %v264_v16  ;;  %v215_v23 = vpack.c.bf16 %v1718_v22, %v1713_v21  ;;  %v1732_v28 = vld [vmem:[%s2155_s26 + $0x18] sm:$0xff]  ;;  %v1303_v55 = vld [vmem:[#allocation2] ss:$0 sm:$0xff] }
  0x2c   :  { %v283_v26 = vsel %vm189_vm0, %v259_v25, 0  ;;  %v216_v29 = vpack.c.bf16 %v1732_v28, %v1727_v27  ;;  %v1551_v25 = vmov 0  }
  0x2d   :  { %240 = vmatpush.bf16.msra.mxu1 %v221_v17  ;;  %292 = vmatpush.bf16.xpose.msra.mxu3 %v283_v26 }
  0x2e   :  { %1221 = vmatmul.msk.bf16.vlgmr.msra.gmra.mxu0 %vm189_vm0, %v177_v15 }
  0x30   :  { %1223 = vmatmul.msk.bf16.vlgmr.msra.gmra.mxu1 %vm189_vm0, %v215_v23  ;;  %v1550_v23 = vmov 4  }
  0x33   :  { %308 = vmatpush.bf16.xpose.msrb.mxu2 %v264_v16 }
  0x35   :  { %324 = vmatpush.bf16.xpose.msrb.mxu3 %v283_v26 }
  0x3e   :  { %1222 = vmatmul.msk.bf16.gmra.mxu0 %vm189_vm0, %v178_v20 }
  0x40   :  { %1224 = vmatmul.msk.bf16.gmra.mxu1 %vm189_vm0, %v216_v29 }
  0xab   :  { %v205_v31 = vpop.f32.mrf.mxu0 }
  0xac   :  { %v206_v32 = vadd.f32 %v1302_v30, %v205_v31  ;;  %v430_v31 = vlaneseq }
  0xad   :  { %v242_v54 = vpop.f32.mrf.mxu1 }
  0xae   :  { %v254_v33 = vpack.c.bf16 %v206_v32, %v206_v32  ;;  %v243_v58 = vadd.f32 %v1303_v55, %v242_v54  ;;  %v1789_v32 = vshrl.u32 %v430_v31, 7 }
  0xb0   :  { %1225 = vmatmul.msk.bf16.vlgmr.msra.gmra.mxu2 %vm189_vm0, %v254_v33  ;;  %v335_v34 = vunpack.c.l.b16 %v254_v33  ;;  %v775_v59 = vsel %vm774_vm1, %v254_v33, 0  ;;  %v330_v60 = vpack.c.bf16 %v243_v58, %v243_v58  ;;  %v1791_v33 = vand.u32 127, %v430_v31 }
  0xb2   :  { %v336_v35 = vpack.c.b16 %v335_v34, %v335_v34  ;;  %v1796_v34 = vsub.s32 %v1789_v32, %v1791_v33  ;;  %vm434_vm7 = vcmp.gt.s32.totalorder %v1791_v33, %v1789_v32 }
  0xb3   :  { %v207_v36 = vpop.f32.mrf.mxu0 }
  0xb4   :  { %v208_v37 = vadd.f32 %v1302_v30, %v207_v36  ;;  %337 = vrot.lane.b32.xlu0 %v336_v35, %s1544_s18  ;;  %vm543_vm2 = vcmp.eq.s32.totalorder %v1796_v34, 0  ;;  %vm601_vm3 = vcmp.eq.s32.totalorder %v1796_v34, 2  ;;  %vm628_vm4 = vcmp.eq.s32.totalorder %v1796_v34, 3 }
  0xb5   :  { %v244_v61 = vpop.f32.mrf.mxu1  ;;  %vm709_vm5 = vcmp.eq.s32.totalorder %v1796_v34, 6  ;;  %vm574_vm6 = vcmp.eq.s32.totalorder %v1796_v34, 1  ;;  %vm682_vm9 = vcmp.eq.s32.totalorder %v1796_v34, 5  ;;  %vm736_vm10 = vcmp.eq.s32.totalorder %v1796_v34, 7 }
  0xb6   :  { %v255_v38 = vpack.c.bf16 %v208_v37, %v208_v37  ;;  %v245_v1 = vadd.f32 %v1303_v55, %v244_v61  ;;  %vm655_vm11 = vcmp.eq.s32.totalorder %v1796_v34, 4  ;;  %v846_v34 = vld [vmem:[%s2143_s7] sm:$0xff] }
  0xb8   :  { %1226 = vmatmul.msk.bf16.vlgmr.msra.gmra.mxu3 %vm189_vm0, %v255_v38  ;;  %v359_v39 = vunpack.c.l.b16 %v255_v38  ;;  %v793_v0 = vsel %vm774_vm1, %v255_v38, 0  ;;  %v331_v3 = vpack.c.bf16 %v245_v1, %v245_v1 }
  0xba   :  { %v360_v40 = vpack.c.b16 %v359_v39, %v359_v39 }
  0xbb   :  { %v210_v41 = vpop.f32.mrf.mxu0 }
  0xbc   :  { %v211_v42 = vadd.f32 %v1302_v30, %v210_v41  ;;  %361 = vrot.lane.b32.xlu0 %v360_v40, %s1544_s18 }
  0xbd   :  { %v247_v4 = vpop.f32.mrf.mxu1 }
  0xbe   :  { %v256_v43 = vpack.c.bf16 %v211_v42, %v211_v42  ;;  %v248_v7 = vadd.f32 %v1303_v55, %v247_v4 }
  0xc0   :  { %1227 = vmatmul.msk.bf16.vlgmr.msrb.gmra.mxu2 %vm189_vm0, %v256_v43  ;;  %v383_v44 = vunpack.c.l.b16 %v256_v43  ;;  %v811_v8 = vsel %vm774_vm1, %v256_v43, 0  ;;  %v332_v9 = vpack.c.bf16 %v248_v7, %v248_v7 }
  0xc2   :  { %v384_v45 = vpack.c.b16 %v383_v44, %v383_v44 }
  0xc3   :  { %v212_v46 = vpop.f32.mrf.mxu0 }
  0xc4   :  { %v213_v47 = vadd.f32 %v1302_v30, %v212_v46  ;;  %385 = vrot.lane.b32.xlu1 %v384_v45, %s1544_s18 }
  0xc5   :  { %v249_v16 = vpop.f32.mrf.mxu1 }
  0xc6   :  { %v257_v48 = vpack.c.bf16 %v213_v47, %v213_v47  ;;  %v250_v18 = vadd.f32 %v1303_v55, %v249_v16 }
  0xc8   :  { %1228 = vmatmul.msk.bf16.vlgmr.msrb.gmra.mxu3 %vm189_vm0, %v257_v48  ;;  %v407_v49 = vunpack.c.l.b16 %v257_v48  ;;  %v829_v17 = vsel %vm774_vm1, %v257_v48, 0  ;;  %v333_v24 = vpack.c.bf16 %v250_v18, %v250_v18 }
  0xca   :  { %v408_v50 = vpack.c.b16 %v407_v49, %v407_v49 }
  0xcc   :  { %409 = vrot.lane.b32.xlu1 %v408_v50, %s1544_s18 }
 0x126   :  { %v338_v56 = vpop.permute.xlu0 %337 }
 0x127   :  { %v343_v57 = vsel %vm189_vm0, %v338_v56, 0 }
 0x128   :  { %352 = vmatpush.bf16.xpose.msrb.mxu0 %v343_v57 }
 0x12e   :  { %v362_v62 = vpop.permute.xlu0 %361 }
 0x12f   :  { %1229 = vmatmul.msk.bf16.vlgmr.msrb.gmra.mxu0 %vm189_vm0, %v330_v60  ;;  %v367_v63 = vsel %vm189_vm0, %v362_v62, 0 }
 0x130   :  { %784 = vmatpush.bf16.msra.mxu0 %v775_v59  ;;  %376 = vmatpush.bf16.xpose.msrb.mxu1 %v367_v63 }
 0x133   :  { %v1752_v2 = vpop.f32.mrf.mxu2 }
 0x134   :  { %713 = vperm.xlu1 %1269, %v1752_v2   ;;  %578 = vperm.xlu0 %1265, %v1752_v2  }
 0x135   :  { %548 = vperm.xlu2 %1264, %v1752_v2  }
 0x136   :  { %v386_v5 = vpop.permute.xlu1 %385 }
 0x137   :  { %v391_v6 = vsel %vm189_vm0, %v386_v5, 0  ;;  %1230 = vmatmul.msk.bf16.vlgmr.msrb.gmra.mxu1 %vm189_vm0, %v331_v3 }
 0x138   :  { %802 = vmatpush.bf16.msra.mxu1 %v793_v0  ;;  %400 = vmatpush.bf16.xpose.msra.mxu2 %v391_v6 }
 0x13b   :  { %v277_v10 = vpop.f32.mrf.mxu2  ;;  %v1760_v11 = vpop.f32.mrf.mxu3 }
 0x13c   :  { %1272 = vset.pattern.permute.xlu1 %v1546_v52  ;;  %1268 = vset.pattern.permute.xlu0 %v1548_v12  ;;  %v1552_v10 = vmov 3  }
 0x13d   :  { %1266 = vset.pattern.permute.xlu2 %v1549_v13  ;;  %582 = vperm.xlu1 %1272, %v1760_v11  }
 0x13e   :  { %686 = vperm.xlu0 %1268, %v1752_v2   ;;  %605 = vperm.xlu2 %1266, %v1752_v2   ;;  %v410_v14 = vpop.permute.xlu1 %409 }
 0x13f   :  { %v415_v15 = vsel %vm189_vm0, %v410_v14, 0  ;;  %1231 = vmatmul.msk.bf16.vlgmr.msra.gmra.mxu2 %vm189_vm0, %v332_v9 }
 0x140   :  { %820 = vmatpush.bf16.msrb.mxu2 %v811_v8  ;;  %424 = vmatpush.bf16.xpose.msra.mxu3 %v415_v15 }
 0x143   :  { %v296_v19 = vpop.f32.mrf.mxu3  ;;  %v1770_v20 = vpop.f32.mrf.mxu2 }
 0x145   :  { %1274 = vset.pattern.permute.xlu1 %v1550_v23 }
 0x146   :  { %1270 = vset.pattern.permute.xlu0 %v1551_v25  ;;  %1267 = vset.pattern.permute.xlu2 %v1550_v23 }
 0x147   :  { %636 = vperm.xlu1 %1274, %v1760_v11   ;;  %740 = vperm.xlu0 %1270, %v1752_v2  }
 0x148   :  { %838 = vmatpush.bf16.msrb.mxu3 %v829_v17  ;;  %632 = vperm.xlu2 %1267, %v1752_v2  }
 0x149   :  { %1232 = vmatmul.msk.bf16.vlgmr.msra.gmra.mxu3 %vm189_vm0, %v333_v24 }
 0x14b   :  { %v312_v26 = vpop.f32.mrf.mxu2  ;;  %v1777_v29 = vpop.f32.mrf.mxu3 }
 0x14f   :  { %1277 = vset.pattern.permute.xlu1 %v1547_v53  ;;  %1280 = vset.pattern.permute.xlu0 %v1547_v53 }
 0x150   :  { %1271 = vset.pattern.permute.xlu2 %v1547_v53  ;;  %563 = vperm.xlu0 %1280, %v1777_v29  }
 0x151   :  { %553 = vperm.xlu2 %1271, %v1760_v11   ;;  %558 = vperm.xlu1 %1277, %v1770_v20  }
 0x153   :  { %v328_v30 = vpop.f32.mrf.mxu3 }
 0x158   :  { %1281 = vset.pattern.permute.xlu0 %v1546_v52 }
 0x159   :  { %1273 = vset.pattern.permute.xlu2 %v1549_v13  ;;  %1279 = vset.pattern.permute.xlu1 %v1549_v13 }
 0x15a   :  { %590 = vperm.xlu0 %1281, %v1777_v29   ;;  %609 = vperm.xlu2 %1273, %v1760_v11  }
 0x15b   :  { %613 = vperm.xlu1 %1279, %v1770_v20  }
 0x162   :  { %1275 = vset.pattern.permute.xlu2 %v1548_v12  ;;  %1283 = vset.pattern.permute.xlu0 %v1552_v10 }
 0x163   :  { %1284 = vset.pattern.permute.xlu1 %v1551_v25  ;;  %690 = vperm.xlu2 %1275, %v1760_v11  }
 0x164   :  { %744 = vperm.xlu1 %1284, %v1760_v11  }
 0x16b   :  { %1276 = vset.pattern.permute.xlu2 %v1545_v51 }
 0x16c   :  { %1286 = vset.pattern.permute.xlu1 %v1550_v23  ;;  %717 = vperm.xlu2 %1276, %v1760_v11  }
 0x16d   :  { %644 = vperm.xlu1 %1286, %v1777_v29  }
 0x174   :  { %1278 = vset.pattern.permute.xlu2 %v1546_v52 }
 0x175   :  { %1288 = vset.pattern.permute.xlu1 %v1548_v12  ;;  %586 = vperm.xlu2 %1278, %v1770_v20  }
 0x176   :  { %694 = vperm.xlu1 %1288, %v1770_v20  }
 0x17d   :  { %1282 = vset.pattern.permute.xlu2 %v1549_v13 }
 0x17e   :  { %617 = vperm.xlu2 %1282, %v1777_v29   ;;  %1290 = vset.pattern.permute.xlu1 %v1545_v51 }
 0x186   :  { %1285 = vset.pattern.permute.xlu2 %v1550_v23 }
 0x18f   :  { %v549_v35 = vpop.permute.xlu2 %548 }
 0x190   :  { %v566_v36 = vsel %vm543_vm2, %v549_v35, 0.0 }
 0x198   :  { %v606_v37 = vpop.permute.xlu2 %605 }
 0x199   :  { %v620_v38 = vsel %vm601_vm3, %v606_v37, 0.0 }
 0x1a2   :  { %v633_v39 = vpop.permute.xlu2 %632 }
 0x1a3   :  { %v647_v40 = vsel %vm628_vm4, %v633_v39, 0.0 }
 0x1a6   :  { %v714_v41 = vpop.permute.xlu1 %713  ;;  %v579_v42 = vpop.permute.xlu0 %578 }
 0x1a7   :  { %v1823_v43 = vsel %vm709_vm5, %v714_v41, 0.0  ;;  %v593_v44 = vsel %vm574_vm6, %v579_v42, 0.0 }
 0x1a8   :  { %v597_v45 = vadd.f32 %v593_v44, %v566_v36 }
 0x1aa   :  { %v624_v46 = vadd.f32 %v620_v38, %v597_v45 }
 0x1ab   :  { %v554_v47 = vpop.permute.xlu2 %553 }
 0x1ac   :  { %v567_v48 = vsel %vm543_vm2, %v554_v47, 0.0  ;;  %v354_v49 = vpop.f32.mrf.mxu0  ;;  %v1831_v50 = vadd.f32 %v647_v40, %v624_v46 }
 0x1ad   :  { %v437_v52 = vsel %vm434_vm7, %v354_v49, -1e+20 }
 0x1ae   :  { %v1836_v53 = vmul.f32 0.17677669, %v437_v52 }
 0x1af   :  { %v583_v54 = vpop.permute.xlu1 %582 }
 0x1b0   :  { %v594_v55 = vsel %vm574_vm6, %v583_v54, 0.0  ;;  %v687_v56 = vpop.permute.xlu0 %686  ;;  %v446_v57 = vsel %vm445_vm8, %v1836_v53, -inf }
 0x1b1   :  { %v598_v58 = vadd.f32 %v594_v55, %v567_v48  ;;  %v1845_v59 = vsel %vm682_vm9, %v687_v56, 0.0  ;;  %447 = vmax.xlane.f32.xlu2 %v446_v57 }
 0x1b4   :  { %v610_v60 = vpop.permute.xlu2 %609  ;;  %v378_v61 = vpop.f32.mrf.mxu1 }
 0x1b5   :  { %v621_v62 = vsel %vm601_vm3, %v610_v60, 0.0  ;;  %v438_v63 = vsel %vm434_vm7, %v378_v61, -1e+20  ;;  %v356_v0 = vpop.f32.mrf.mxu0 }
 0x1b6   :  { %v625_v1 = vadd.f32 %v621_v62, %v598_v58  ;;  %v1852_v3 = vmul.f32 0.17677669, %v438_v63 }
 0x1b8   :  { %v449_v4 = vsel %vm445_vm8, %v1852_v3, -inf }
 0x1b9   :  { %v637_v5 = vpop.permute.xlu1 %636  ;;  %v741_v6 = vpop.permute.xlu0 %740  ;;  %450 = vmax.xlane.f32.xlu2 %v449_v4 }
 0x1ba   :  { %v648_v7 = vsel %vm628_vm4, %v637_v5, 0.0  ;;  %v1861_v8 = vsel %vm736_vm10, %v741_v6, 0.0 }
 0x1bb   :  { %v1863_v9 = vadd.f32 %v648_v7, %v625_v1 }
 0x1bc   :  { %v380_v13 = vpop.f32.mrf.mxu1 }
 0x1bd   :  { %v691_v14 = vpop.permute.xlu2 %690 }
 0x1be   :  { %v1868_v15 = vsel %vm682_vm9, %v691_v14, 0.0 }
 0x1c2   :  { %v564_v16 = vpop.permute.xlu0 %563  ;;  %v402_v17 = vpop.f32.mrf.mxu2 }
 0x1c3   :  { %v569_v18 = vsel %vm543_vm2, %v564_v16, 0.0  ;;  %v559_v19 = vpop.permute.xlu1 %558  ;;  %v439_v23 = vsel %vm434_vm7, %v402_v17, -1e+20 }
 0x1c4   :  { %v568_v24 = vsel %vm543_vm2, %v559_v19, 0.0  ;;  %v1877_v26 = vmul.f32 0.17677669, %v439_v23 }
 0x1c6   :  { %v718_v30 = vpop.permute.xlu2 %717  ;;  %v452_v31 = vsel %vm445_vm8, %v1877_v26, -inf }
 0x1c7   :  { %v1883_v35 = vsel %vm709_vm5, %v718_v30, 0.0  ;;  %453 = vmax.xlane.f32.xlu0 %v452_v31 }
 0x1ca   :  { %v404_v36 = vpop.f32.mrf.mxu2 }
 0x1cc   :  { %v426_v37 = vpop.f32.mrf.mxu3  ;;  %v591_v38 = vpop.permute.xlu0 %590 }
 0x1cd   :  { %v440_v39 = vsel %vm434_vm7, %v426_v37, -1e+20  ;;  %v596_v40 = vsel %vm574_vm6, %v591_v38, 0.0  ;;  %v614_v41 = vpop.permute.xlu1 %613 }
 0x1ce   :  { %v444_v42 = vmul.f32 0.17677669, %v440_v39  ;;  %v600_v44 = vadd.f32 %v596_v40, %v569_v18  ;;  %v622_v45 = vsel %vm601_vm3, %v614_v41, 0.0 }
 0x1cf   :  { %v587_v46 = vpop.permute.xlu2 %586 }
 0x1d0   :  { %v455_v47 = vsel %vm445_vm8, %v444_v42, -inf  ;;  %v595_v48 = vsel %vm574_vm6, %v587_v46, 0.0 }
 0x1d1   :  { %456 = vmax.xlane.f32.xlu1 %v455_v47  ;;  %v599_v49 = vadd.f32 %v595_v48, %v568_v24  ;;  %640 = vperm.xlu2 %1285, %v1770_v20  }
 0x1d3   :  { %v626_v33 = vadd.f32 %v622_v45, %v599_v49 }
 0x1d4   :  { %v428_v32 = vpop.f32.mrf.mxu3 }
 0x1d6   :  { %v745_v52 = vpop.permute.xlu1 %744 }
 0x1d7   :  { %v1898_v54 = vsel %vm736_vm10, %v745_v52, 0.0 }
 0x1d8   :  { %v618_v55 = vpop.permute.xlu2 %617 }
 0x1d9   :  { %v623_v56 = vsel %vm601_vm3, %v618_v55, 0.0  ;;  %1287 = vset.pattern.permute.xlu2 %v1552_v10 }
 0x1da   :  { %v627_v57 = vadd.f32 %v623_v56, %v600_v44  ;;  %667 = vperm.xlu2 %1287, %v1770_v20  }
 0x1db   :  { %659 = vperm.xlu0 %1283, %v1752_v2  }
 0x1df   :  { %v645_v58 = vpop.permute.xlu1 %644 }
 0x1e0   :  { %v650_v60 = vsel %vm628_vm4, %v645_v58, 0.0 }
 0x1e1   :  { %v1907_v61 = vadd.f32 %v650_v60, %v627_v57 }
 0x1e2   :  { %1289 = vset.pattern.permute.xlu2 %v1548_v12 }
 0x1e3   :  { %663 = vperm.xlu0 %1283, %v1760_v11   ;;  %698 = vperm.xlu2 %1289, %v1777_v29  }
 0x1e8   :  { %v695_v14 = vpop.permute.xlu1 %694 }
 0x1e9   :  { %v703_v24 = vsel %vm682_vm9, %v695_v14, 0.0 }
 0x1ea   :  { %721 = vperm.xlu1 %1290, %v1770_v20  }
 0x1eb   :  { %671 = vperm.xlu0 %1283, %v1777_v29   ;;  %1291 = vset.pattern.permute.xlu2 %v1545_v51 }
 0x1f2   :  { %1293 = vset.pattern.permute.xlu1 %v1551_v25 }
 0x1f3   :  { %1292 = vset.pattern.permute.xlu0 %v1551_v25 }
 0x1f4   :  { %748 = vperm.xlu0 %1292, %v1770_v20  }
 0x224   :  { %v448_v2 = vpop.xlane.xlu2 %447 }
 0x225   :  { %v458_v62 = vsub.f32 %v1836_v53, %v448_v2 }
 0x227   :  { %v462_v63 = vmul.f32 1.442695, %v458_v62 }
 0x229   :  { %1308 = vpow2.f32 %v462_v63 }
 0x22c   :  { %v451_v11 = vpop.xlane.xlu2 %450 }
 0x22d   :  { %v459_v0 = vsub.f32 %v1852_v3, %v451_v11 }
 0x22f   :  { %v1920_v1 = vpop.eup %1308  ;;  %v464_v4 = vmul.f32 1.442695, %v459_v0 }
 0x230   :  { %v470_v5 = vsel %vm445_vm8, %v1920_v1, 0.0 }
 0x231   :  { %1310 = vpow2.f32 %v464_v4  ;;  %471 = vadd.xlane.f32.xlu2 %v470_v5 }
 0x234   :  { %v641_v6 = vpop.permute.xlu2 %640 }
 0x235   :  { %v649_v20 = vsel %vm628_vm4, %v641_v6, 0.0 }
 0x236   :  { %v653_v7 = vadd.f32 %v649_v20, %v626_v33 }
 0x237   :  { %v1926_v13 = vpop.eup %1310 }
 0x238   :  { %v473_v53 = vsel %vm445_vm8, %v1926_v13, 0.0 }
 0x239   :  { %474 = vadd.xlane.f32.xlu2 %v473_v53 }
 0x23a   :  { %v454_v3 = vpop.xlane.xlu0 %453 }
 0x23b   :  { %v460_v16 = vsub.f32 %v1877_v26, %v454_v3 }
 0x23c   :  { %v668_v17 = vpop.permute.xlu2 %667 }
 0x23d   :  { %v466_v18 = vmul.f32 1.442695, %v460_v16  ;;  %v676_v19 = vsel %vm655_vm11, %v668_v17, 0.0 }
 0x23e   :  { %v680_v23 = vadd.f32 %v676_v19, %v653_v7 }
 0x23f   :  { %1312 = vpow2.f32 %v466_v18 }
 0x240   :  { %v707_v30 = vadd.f32 %v703_v24, %v680_v23 }
 0x244   :  { %v457_v31 = vpop.xlane.xlu1 %456  ;;  %v699_v56 = vpop.permute.xlu2 %698 }
 0x245   :  { %v461_v36 = vsub.f32 %v444_v42, %v457_v31  ;;  %v1936_v37 = vpop.eup %1312 }
 0x246   :  { %v476_v39 = vsel %vm445_vm8, %v1936_v37, 0.0 }
 0x247   :  { %v468_v38 = vmul.f32 1.442695, %v461_v36  ;;  %477 = vadd.xlane.f32.xlu2 %v476_v39 }
 0x249   :  { %1314 = vpow2.f32 %v468_v38 }
 0x24d   :  { %v660_v26 = vpop.permute.xlu0 %659 }
 0x24e   :  { %v674_v41 = vsel %vm655_vm11, %v660_v26, 0.0 }
 0x24f   :  { %v1940_v40 = vpop.eup %1314  ;;  %v678_v44 = vadd.f32 %v674_v41, %v1831_v50 }
 0x250   :  { %v479_v45 = vsel %vm445_vm8, %v1940_v40, 0.0 }
 0x251   :  { %480 = vadd.xlane.f32.xlu1 %v479_v45  ;;  %v705_v42 = vadd.f32 %v1845_v59, %v678_v44 }
 0x253   :  { %v732_v46 = vadd.f32 %v1823_v43, %v705_v42 }
 0x255   :  { %v759_v47 = vadd.f32 %v1861_v8, %v732_v46  ;;  %v664_v48 = vpop.permute.xlu0 %663 }
 0x256   :  { %v675_v49 = vsel %vm655_vm11, %v664_v48, 0.0 }
 0x257   :  { %v679_v32 = vadd.f32 %v675_v49, %v1863_v9  ;;  %v704_v9 = vsel %vm682_vm9, %v699_v56, 0.0 }
 0x259   :  { %v706_v33 = vadd.f32 %v1868_v15, %v679_v32 }
 0x25b   :  { %v733_v50 = vadd.f32 %v1883_v35, %v706_v33 }
 0x25c   :  { %v722_v52 = vpop.permute.xlu1 %721 }
 0x25d   :  { %v730_v55 = vsel %vm709_vm5, %v722_v52, 0.0  ;;  %v760_v59 = vadd.f32 %v1898_v54, %v733_v50  ;;  %v672_v57 = vpop.permute.xlu0 %671 }
 0x25e   :  { %v734_v43 = vadd.f32 %v730_v55, %v707_v30  ;;  %v677_v8 = vsel %vm655_vm11, %v672_v57, 0.0 }
 0x25f   :  { %v681_v58 = vadd.f32 %v677_v8, %v1907_v61  ;;  %725 = vperm.xlu2 %1291, %v1777_v29  }
 0x261   :  { %v708_v15 = vadd.f32 %v704_v9, %v681_v58 }
 0x266   :  { %v749_v35 = vpop.permute.xlu0 %748 }
 0x267   :  { %v757_v60 = vsel %vm736_vm10, %v749_v35, 0.0  ;;  %1294 = vset.pattern.permute.xlu2 %v1551_v25 }
 0x268   :  { %v1967_v54 = vadd.f32 %v757_v60, %v734_v43 }
 0x26a   :  { %752 = vperm.xlu1 %1293, %v1777_v29  }
 0x272   :  { %1295 = vset.pattern.permute.xlu1 %v1545_v51 }
 0x2a4   :  { %v472_v2 = vpop.xlane.xlu2 %471 }
 0x2a5   :  { %1316 = vrcp.f32 %v472_v2  ;;  %v493_v0 = vand.u32 2147483648, %v472_v2  ;;  %v491_v5 = vand.u32 2147483647, %v472_v2  ;;  %vm487_vm13 = vweird.f32 %v472_v2 }
 0x2a7   :  { %v494_v20 = vor.u32 1.1754944e-38, %v493_v0  ;;  %vm492_vm15 = vcmp.eq.f32.partialorder %v491_v5, 8.507059e+37  ;;  %v848_v5 = vld [vmem:[%s2143_s7 + $0x10] sm:$0xff] }
 0x2ab   :  { %v1317_v61 = vpop.eup %1316 }
 0x2ac   :  { %v483_v62 = vmul.f32 %v1317_v61, %v472_v2  ;;  %v475_v63 = vpop.xlane.xlu2 %474  ;;  %vm488_vm12 = vweird.f32 %v1317_v61 }
 0x2ad   :  { %1318 = vrcp.f32 %v475_v63  ;;  %vm489_vm14 = vmor %vm487_vm13, %vm488_vm12  ;;  %v508_v16 = vand.u32 2147483648, %v475_v63  ;;  %v506_v18 = vand.u32 2147483647, %v475_v63  ;;  %vm502_vm2 = vweird.f32 %v475_v63 }
 0x2ae   :  { %v484_v11 = vsub.f32 1.0, %v483_v62 }
 0x2af   :  { %v509_v31 = vor.u32 1.1754944e-38, %v508_v16  ;;  %vm507_vm4 = vcmp.eq.f32.partialorder %v506_v18, 8.507059e+37 }
 0x2b0   :  { %v485_v4 = vmul.f32 %v1317_v61, %v484_v11 }
 0x2b2   :  { %v486_v6 = vadd.f32 %v1317_v61, %v485_v4 }
 0x2b3   :  { %v1319_v25 = vpop.eup %1318 }
 0x2b4   :  { %v490_v7 = vsel %vm489_vm14, %v1317_v61, %v486_v6  ;;  %v498_v29 = vmul.f32 %v1319_v25, %v475_v63  ;;  %vm503_vm1 = vweird.f32 %v1319_v25  ;;  %v849_v6 = vld [vmem:[%s2143_s7 + $0x18] sm:$0xff] }
 0x2b5   :  { %v495_v53 = vsel %vm492_vm15, %v494_v20, %v490_v7  ;;  %vm504_vm3 = vmor %vm502_vm2, %vm503_vm1 }
 0x2b6   :  { %v496_v3 = vmul.f32 %v1920_v1, %v495_v53  ;;  %v499_v14 = vsub.f32 1.0, %v498_v29 }
 0x2b8   :  { %v500_v17 = vmul.f32 %v1319_v25, %v499_v14  ;;  %v763_v19 = vadd.f32 %v759_v47, %v496_v3 }
 0x2ba   :  { %v501_v23 = vadd.f32 %v1319_v25, %v500_v17  ;;  %v478_v24 = vpop.xlane.xlu2 %477  ;;  %v767_v30 = vpack.c.bf16 %v763_v19, %v763_v19 }
 0x2bb   :  { %1320 = vrcp.f32 %v478_v24  ;;  %v523_v48 = vand.u32 2147483648, %v478_v24  ;;  %v521_v33 = vand.u32 2147483647, %v478_v24  ;;  %vm517_vm7 = vweird.f32 %v478_v24 }
 0x2bc   :  { %v505_v36 = vsel %vm504_vm3, %v1319_v25, %v501_v23  ;;  %1233 = vmatmul.msk.bf16.vlgmr.msra.gmra.mxu0 %vm445_vm8, %v767_v30  ;;  %v851_v25 = vpack.c.bf16 %v849_v6, %v848_v5 }
 0x2bd   :  { %v510_v38 = vsel %vm507_vm4, %v509_v31, %v505_v36  ;;  %vm522_vm11 = vcmp.eq.f32.partialorder %v521_v33, 8.507059e+37 }
 0x2be   :  { %v511_v1 = vmul.f32 %v1926_v13, %v510_v38  ;;  %v524_v13 = vor.u32 1.1754944e-38, %v523_v48  ;;  %868 = vmatpush.bf16.msrb.mxu0 %v851_v25 }
 0x2c0   :  { %v764_v39 = vadd.f32 %v760_v59, %v511_v1 }
 0x2c1   :  { %v1321_v26 = vpop.eup %1320 }
 0x2c2   :  { %v513_v41 = vmul.f32 %v1321_v26, %v478_v24  ;;  %v726_v44 = vpop.permute.xlu2 %725  ;;  %v768_v45 = vpack.c.bf16 %v764_v39, %v764_v39  ;;  %vm518_vm6 = vweird.f32 %v1321_v26  ;;  %v1304_v24 = vld [vmem:[#allocation6] ss:$0 sm:$0xff] }
 0x2c3   :  { %v731_v46 = vsel %vm709_vm5, %v726_v44, 0.0  ;;  %vm519_vm9 = vmor %vm517_vm7, %vm518_vm6 }
 0x2c4   :  { %v481_v42 = vpop.xlane.xlu1 %480  ;;  %v514_v47 = vsub.f32 1.0, %v513_v41  ;;  %1234 = vmatmul.msk.bf16.vlgmr.msra.gmra.mxu1 %vm445_vm8, %v768_v45  ;;  %v735_v49 = vadd.f32 %v731_v46, %v708_v15 }
 0x2c5   :  { %1322 = vrcp.f32 %v481_v42  ;;  %v538_v35 = vand.u32 2147483648, %v481_v42  ;;  %vm532_vm12 = vweird.f32 %v481_v42  ;;  %v536_v60 = vand.u32 2147483647, %v481_v42 }
 0x2c6   :  { %v515_v32 = vmul.f32 %v1321_v26, %v514_v47 }
 0x2c7   :  { %v539_v61 = vor.u32 1.1754944e-38, %v538_v35  ;;  %vm537_vm14 = vcmp.eq.f32.partialorder %v536_v60, 8.507059e+37 }
 0x2c8   :  { %v516_v50 = vadd.f32 %v1321_v26, %v515_v32 }
 0x2ca   :  { %v520_v55 = vsel %vm519_vm9, %v1321_v26, %v516_v50 }
 0x2cb   :  { %v1323_v52 = vpop.eup %1322  ;;  %v525_v56 = vsel %vm522_vm11, %v524_v13, %v520_v55 }
 0x2cc   :  { %v528_v59 = vmul.f32 %v1323_v52, %v481_v42  ;;  %v526_v43 = vmul.f32 %v1936_v37, %v525_v56  ;;  %vm533_vm5 = vweird.f32 %v1323_v52 }
 0x2cd   :  { %vm534_vm13 = vmor %vm532_vm12, %vm533_vm5 }
 0x2ce   :  { %v529_v57 = vsub.f32 1.0, %v528_v59  ;;  %v765_v8 = vadd.f32 %v1967_v54, %v526_v43 }
 0x2d0   :  { %v530_v58 = vmul.f32 %v1323_v52, %v529_v57  ;;  %v769_v9 = vpack.c.bf16 %v765_v8, %v765_v8 }
 0x2d2   :  { %1235 = vmatmul.msk.bf16.vlgmr.msrb.gmra.mxu2 %vm445_vm8, %v769_v9  ;;  %v531_v15 = vadd.f32 %v1323_v52, %v530_v58 }
 0x2d4   :  { %v535_v2 = vsel %vm534_vm13, %v1323_v52, %v531_v15 }
 0x2d5   :  { %v540_v62 = vsel %vm537_vm14, %v539_v61, %v535_v2 }
 0x2d6   :  { %v541_v54 = vmul.f32 %v1940_v40, %v540_v62  ;;  %v847_v40 = vld [vmem:[%s2143_s7 + $0x8] sm:$0xff] }
 0x2d7   :  { %v850_v20 = vpack.c.bf16 %v847_v40, %v846_v34 }
 0x2d9   :  { %869 = vmatpush.bf16.msrb.mxu0 %v850_v20 }
 0x2dc   :  { %v753_v63 = vpop.permute.xlu1 %752 }
 0x2dd   :  { %v758_v37 = vsel %vm736_vm10, %v753_v63, 0.0 }
 0x2de   :  { %v762_v11 = vadd.f32 %v758_v37, %v735_v49 }
 0x2e0   :  { %v766_v0 = vadd.f32 %v762_v11, %v541_v54 }
 0x2e2   :  { %v770_v4 = vpack.c.bf16 %v766_v0, %v766_v0 }
 0x2e4   :  { %1236 = vmatmul.msk.bf16.vlgmr.msrb.gmra.mxu3 %vm445_vm8, %v770_v4 }
 0x339   :  { %v786_v7 = vpop.f32.mrf.mxu0 }
 0x341   :  { %v788_v29 = vpop.f32.mrf.mxu0  ;;  %v804_v53 = vpop.f32.mrf.mxu1 }
 0x342   :  { %v844_v3 = vpack.c.bf16 %v804_v53, %v786_v7 }
 0x344   :  { %1237 = vmatmul.msk.bf16.vlgmr.msrb.gmra.mxu0 %vm189_vm0, %v844_v3 }
 0x349   :  { %v806_v14 = vpop.f32.mrf.mxu1 }
 0x355   :  { %v822_v16 = vpop.f32.mrf.mxu2 }
 0x35d   :  { %v824_v17 = vpop.f32.mrf.mxu2 }
 0x367   :  { %v840_v18 = vpop.f32.mrf.mxu3 }
 0x368   :  { %v845_v19 = vpack.c.bf16 %v840_v18, %v822_v16 }
 0x36a   :  { %1238 = vmatmul.msk.bf16.gmra.mxu0 %vm189_vm0, %v845_v19 }
 0x36f   :  { %v842_v23 = vpop.f32.mrf.mxu3 }
 0x3c1   :  { %v871_v30 = vpop.f32.mrf.mxu0 }
 0x3c2   :  { %v872_v31 = vadd.f32 %v1304_v24, %v871_v30 }
 0x3c4   :  { %v1999_v36 = vadd.f32 %v872_v31, %v1713_v21  ;;  %v2049_v31 = vld [vmem:[%s2149_s13 + $0x8] sm:$0xff] }
 0x3c6   :  { %v887_v38 = vsel %vm189_vm0, %v1999_v36, 0.0  ;;  %v899_v1 = vmul.f32 %v1999_v36, %v1999_v36 }
 0x3c7   :  { %888 = vadd.xlane.f32.xlu2 %v887_v38 }
 0x3c8   :  { %v903_v39 = vsel %vm189_vm0, %v899_v1, 0.0 }
 0x3c9   :  { %v873_v26 = vpop.f32.mrf.mxu0  ;;  %904 = vadd.xlane.f32.xlu1 %v903_v39 }
 0x3ca   :  { %v874_v41 = vadd.f32 %v1304_v24, %v873_v26  ;;  %v989_v26 = vld [vmem:[%s2145_s9 + $0x10] sm:$0xff] }
 0x3cc   :  { %v2007_v44 = vadd.f32 %v874_v41, %v1718_v22  ;;  %v990_v41 = vld [vmem:[%s2145_s9 + $0x18] sm:$0xff] }
 0x3ce   :  { %v890_v45 = vsel %vm189_vm0, %v2007_v44, 0.0  ;;  %v900_v52 = vmul.f32 %v2007_v44, %v2007_v44 }
 0x3d0   :  { %v906_v55 = vsel %vm189_vm0, %v900_v52, 0.0 }
 0x3d1   :  { %891 = vadd.xlane.f32.xlu1 %v890_v45  ;;  %v992_v45 = vpack.c.bf16 %v990_v41, %v989_v26 }
 0x3d3   :  { %1009 = vmatpush.bf16.msrb.mxu1 %v992_v45 }
 0x3e7   :  { %v876_v21 = vpop.f32.mrf.mxu0 }
 0x3e8   :  { %v877_v42 = vadd.f32 %v1304_v24, %v876_v21  ;;  %v987_v21 = vld [vmem:[%s2145_s9] sm:$0xff] }
 0x3ea   :  { %v2012_v46 = vadd.f32 %v877_v42, %v1727_v27 }
 0x3ec   :  { %v893_v47 = vsel %vm189_vm0, %v2012_v46, 0.0  ;;  %v901_v32 = vmul.f32 %v2012_v46, %v2012_v46 }
 0x3ed   :  { %894 = vadd.xlane.f32.xlu0 %v893_v47 }
 0x3ee   :  { %v909_v33 = vsel %vm189_vm0, %v901_v32, 0.0 }
 0x3ef   :  { %v878_v48 = vpop.f32.mrf.mxu0 }
 0x3f0   :  { %v879_v49 = vadd.f32 %v1304_v24, %v878_v48 }
 0x3f2   :  { %v2019_v22 = vadd.f32 %v879_v49, %v1732_v28  ;;  %v2033_v28 = vld [vmem:[%s2149_s13] sm:$0xff] }
 0x3f4   :  { %v896_v50 = vsel %vm189_vm0, %v2019_v22, 0.0  ;;  %v902_v27 = vmul.f32 %v2019_v22, %v2019_v22 }
 0x3f5   :  { %910 = vadd.xlane.f32.xlu0 %v909_v33  ;;  %897 = vadd.xlane.f32.xlu2 %v896_v50 }
 0x3f6   :  { %v912_v13 = vsel %vm189_vm0, %v902_v27, 0.0 }
 0x3f7   :  { %913 = vadd.xlane.f32.xlu1 %v912_v13 }
 0x3fd   :  { %907 = vadd.xlane.f32.xlu2 %v906_v55 }
 0x410   :  { %973 = vperm.xlu1 %1295, %v2033_v28  }
 0x418   :  { %1299 = vset.pattern.permute.xlu1 %v1552_v10 }
 0x43a   :  { %v889_v59 = vpop.xlane.xlu2 %888 }
 0x43c   :  { %v905_v56 = vpop.xlane.xlu1 %904 }
 0x444   :  { %v892_v8 = vpop.xlane.xlu1 %891 }
 0x460   :  { %v895_v43 = vpop.xlane.xlu0 %894 }
 0x461   :  { %v915_v57 = vadd.f32 %v895_v43, %v889_v59 }
 0x463   :  { %v2037_v58 = vmul.f32 0.015625, %v915_v57 }
 0x465   :  { %v923_v2 = vmul.f32 %v2037_v58, %v2037_v58  ;;  %v953_v48 = vsub.f32 %v1999_v36, %v2037_v58 }
 0x468   :  { %v911_v9 = vpop.xlane.xlu0 %910  ;;  %v898_v15 = vpop.xlane.xlu2 %897 }
 0x469   :  { %v919_v35 = vadd.f32 %v911_v9, %v905_v56  ;;  %v916_v61 = vadd.f32 %v898_v15, %v892_v8  ;;  %v955_v56 = vsub.f32 %v2012_v46, %v2037_v58  ;;  %v1039_v15 = vld [vmem:[#allocation9 + $0x18] sm:$0xff] }
 0x46a   :  { %v914_v54 = vpop.xlane.xlu1 %913  ;;  %v1305_v46 = vld [vmem:[#allocation7] ss:$0 sm:$0xff] }
 0x46b   :  { %v921_v60 = vmul.f32 0.015625, %v919_v35  ;;  %v2041_v37 = vmul.f32 0.015625, %v916_v61 }
 0x46d   :  { %v925_v62 = vsub.f32 %v921_v60, %v923_v2  ;;  %v924_v5 = vmul.f32 %v2041_v37, %v2041_v37  ;;  %v954_v32 = vsub.f32 %v2007_v44, %v2041_v37  ;;  %v956_v59 = vsub.f32 %v2019_v22, %v2041_v37  ;;  %v1038_v44 = vld [vmem:[#allocation9 + $0x10] sm:$0xff]  ;;  %v1036_v60 = vld [vmem:[#allocation9] sm:$0xff]  ;;  %v1037_v2 = vld [vmem:[#allocation9 + $0x8] sm:$0xff] }
 0x46e   :  { %v1041_v35 = vpack.c.bf16 %v1039_v15, %v1038_v44  ;;  %v1040_v61 = vpack.c.bf16 %v1037_v2, %v1036_v60 }
 0x46f   :  { %v927_v63 = vmax.f32 %v925_v62, 0.0 }
 0x470   :  { %v908_v11 = vpop.xlane.xlu2 %907  ;;  %1058 = vmatpush.bf16.msra.mxu2 %v1041_v35 }
 0x471   :  { %v929_v0 = vadd.f32 1e-05, %v927_v63  ;;  %v920_v4 = vadd.f32 %v914_v54, %v908_v11 }
 0x473   :  { %1324 = vrsqrt.f32 %v929_v0  ;;  %v922_v6 = vmul.f32 0.015625, %v920_v4  ;;  %vm937_vm10 = vweird.f32 %v929_v0 }
 0x474   :  { %1059 = vmatpush.bf16.msra.mxu2 %v1040_v61 }
 0x475   :  { %v926_v25 = vsub.f32 %v922_v6, %v924_v5 }
 0x477   :  { %v928_v34 = vmax.f32 %v926_v25, 0.0 }
 0x479   :  { %v1325_v40 = vpop.eup %1324  ;;  %v930_v20 = vadd.f32 1e-05, %v928_v34 }
 0x47a   :  { %v932_v7 = vmul.f32 %v1325_v40, %v929_v0  ;;  %vm938_vm8 = vweird.f32 %v1325_v40 }
 0x47b   :  { %1326 = vrsqrt.f32 %v930_v20  ;;  %vm939_vm15 = vmor %vm937_vm10, %vm938_vm8  ;;  %vm947_vm2 = vweird.f32 %v930_v20 }
 0x47c   :  { %v933_v29 = vmul.f32 %v1325_v40, %v932_v7 }
 0x47e   :  { %v934_v53 = vmul.f32 0.5, %v933_v29 }
 0x480   :  { %v935_v3 = vsub.f32 1.5, %v934_v53 }
 0x481   :  { %v1327_v14 = vpop.eup %1326 }
 0x482   :  { %v942_v16 = vmul.f32 %v1327_v14, %v930_v20  ;;  %v936_v17 = vmul.f32 %v1325_v40, %v935_v3  ;;  %vm948_vm1 = vweird.f32 %v1327_v14  ;;  %v974_v33 = vpop.permute.xlu1 %973  ;;  %v1306_v3 = vld [vmem:[#allocation10] ss:$0 sm:$0xff] }
 0x483   :  { %vm949_vm3 = vmor %vm947_vm2, %vm948_vm1 }
 0x484   :  { %v943_v18 = vmul.f32 %v1327_v14, %v942_v16  ;;  %v940_v19 = vsel %vm939_vm15, %v1325_v40, %v936_v17 }
 0x485   :  { %v951_v23 = vmul.f32 %v940_v19, %v2033_v28 }
 0x486   :  { %v944_v24 = vmul.f32 0.5, %v943_v18 }
 0x487   :  { %959 = vperm.xlu2 %1294, %v951_v23  }
 0x488   :  { %v945_v30 = vsub.f32 1.5, %v944_v24 }
 0x48a   :  { %v946_v38 = vmul.f32 %v1327_v14, %v945_v30 }
 0x48c   :  { %v950_v1 = vsel %vm949_vm3, %v1327_v14, %v946_v38 }
 0x48d   :  { %v952_v39 = vmul.f32 %v950_v1, %v2049_v31 }
 0x48f   :  { %964 = vperm.xlu0 %1292, %v952_v39   ;;  %1297 = vset.pattern.permute.xlu2 %v1548_v12 }
 0x497   :  { %1296 = vset.pattern.permute.xlu0 %v1545_v51  ;;  %v988_v51 = vld [vmem:[%s2145_s9 + $0x8] sm:$0xff] }
 0x498   :  { %978 = vperm.xlu0 %1296, %v2049_v31   ;;  %v991_v42 = vpack.c.bf16 %v988_v51, %v987_v21 }
 0x49a   :  { %1010 = vmatpush.bf16.msrb.mxu1 %v991_v42 }
 0x4a0   :  { %1298 = vset.pattern.permute.xlu0 %v1548_v12 }
 0x4e1   :  { %v960_v47 = vpop.permute.xlu2 %959 }
 0x4e2   :  { %v967_v49 = vmul.f32 %v960_v47, %v953_v48  ;;  %v969_v43 = vmul.f32 %v960_v47, %v955_v56 }
 0x4e4   :  { %v981_v13 = vadd.f32 %v974_v33, %v967_v49  ;;  %v983_v8 = vadd.f32 %v974_v33, %v969_v43 }
 0x501   :  { %v965_v12 = vpop.permute.xlu0 %964 }
 0x502   :  { %v968_v50 = vmul.f32 %v965_v12, %v954_v32  ;;  %v970_v36 = vmul.f32 %v965_v12, %v956_v59 }
 0x50a   :  { %v979_v27 = vpop.permute.xlu0 %978 }
 0x50b   :  { %v982_v52 = vadd.f32 %v979_v27, %v968_v50  ;;  %v984_v57 = vadd.f32 %v979_v27, %v970_v36 }
 0x50d   :  { %v985_v55 = vpack.c.bf16 %v982_v52, %v981_v13  ;;  %v986_v9 = vpack.c.bf16 %v984_v57, %v983_v8 }
 0x50f   :  { %1239 = vmatmul.msk.bf16.vlgmr.msrb.gmra.mxu1 %vm189_vm0, %v985_v55 }
 0x51f   :  { %1240 = vmatmul.msk.bf16.gmra.mxu1 %vm189_vm0, %v986_v9 }
 0x58c   :  { %v1012_v62 = vpop.f32.mrf.mxu1 }
 0x58d   :  { %v1013_v58 = vadd.f32 %v1305_v46, %v1012_v62 }
 0x58f   :  { %v1026_v22 = vmul.f32 0.01, %v1013_v58  ;;  %vm1022_vm4 = vcmp.gt.f32.partialorder %v1013_v58, 0.0 }
 0x591   :  { %v1030_v11 = vsel %vm1022_vm4, %v1013_v58, %v1026_v22 }
 0x594   :  { %v1014_v63 = vpop.f32.mrf.mxu1 }
 0x595   :  { %v1015_v37 = vadd.f32 %v1305_v46, %v1014_v63 }
 0x597   :  { %vm1023_vm6 = vcmp.gt.f32.partialorder %v1015_v37, 0.0  ;;  %v1027_v54 = vmul.f32 0.01, %v1015_v37 }
 0x599   :  { %v1031_v0 = vsel %vm1023_vm6, %v1015_v37, %v1027_v54 }
 0x59a   :  { %v1034_v4 = vpack.c.bf16 %v1031_v0, %v1030_v11 }
 0x59c   :  { %v1017_v5 = vpop.f32.mrf.mxu1  ;;  %1241 = vmatmul.msk.bf16.vlgmr.msra.gmra.mxu2 %vm189_vm0, %v1034_v4 }
 0x59d   :  { %v1018_v6 = vadd.f32 %v1305_v46, %v1017_v5 }
 0x59f   :  { %v1028_v34 = vmul.f32 0.01, %v1018_v6  ;;  %vm1024_vm7 = vcmp.gt.f32.partialorder %v1018_v6, 0.0 }
 0x5a1   :  { %v1032_v7 = vsel %vm1024_vm7, %v1018_v6, %v1028_v34 }
 0x5a4   :  { %v1019_v25 = vpop.f32.mrf.mxu1 }
 0x5a5   :  { %v1020_v40 = vadd.f32 %v1305_v46, %v1019_v25 }
 0x5a7   :  { %vm1025_vm9 = vcmp.gt.f32.partialorder %v1020_v40, 0.0  ;;  %v1029_v20 = vmul.f32 0.01, %v1020_v40 }
 0x5a9   :  { %v1033_v29 = vsel %vm1025_vm9, %v1020_v40, %v1029_v20 }
 0x5aa   :  { %v1035_v53 = vpack.c.bf16 %v1033_v29, %v1032_v7 }
 0x5ac   :  { %1242 = vmatmul.msk.bf16.gmra.mxu2 %vm189_vm0, %v1035_v53 }
 0x61f   :  { %v1061_v14 = vpop.f32.mrf.mxu2 }
 0x620   :  { %v1062_v16 = vadd.f32 %v1306_v3, %v1061_v14 }
 0x622   :  { %v2080_v17 = vadd.f32 %v1062_v16, %v981_v13 }
 0x624   :  { %v1075_v18 = vsel %vm189_vm0, %v2080_v17, 0.0  ;;  %v1087_v19 = vmul.f32 %v2080_v17, %v2080_v17 }
 0x625   :  { %1076 = vadd.xlane.f32.xlu2 %v1075_v18 }
 0x626   :  { %v1091_v23 = vsel %vm189_vm0, %v1087_v19, 0.0  ;;  %v1175_v19 = vld [vmem:[#allocation12 + $0x10] sm:$0xff] }
 0x627   :  { %v1063_v24 = vpop.f32.mrf.mxu2  ;;  %1092 = vadd.xlane.f32.xlu1 %v1091_v23  ;;  %v1176_v23 = vld [vmem:[#allocation12 + $0x18] sm:$0xff] }
 0x628   :  { %v1064_v30 = vadd.f32 %v1306_v3, %v1063_v24  ;;  %v1173_v24 = vld [vmem:[#allocation12] sm:$0xff] }
 0x62a   :  { %v2087_v38 = vadd.f32 %v1064_v30, %v982_v52  ;;  %v1174_v30 = vld [vmem:[#allocation12 + $0x8] sm:$0xff] }
 0x62c   :  { %v1078_v1 = vsel %vm189_vm0, %v2087_v38, 0.0  ;;  %v1088_v33 = vmul.f32 %v2087_v38, %v2087_v38 }
 0x62e   :  { %v1094_v50 = vsel %vm189_vm0, %v1088_v33, 0.0 }
 0x62f   :  { %v1066_v39 = vpop.f32.mrf.mxu2  ;;  %1079 = vadd.xlane.f32.xlu1 %v1078_v1  ;;  %v1177_v1 = vpack.c.bf16 %v1174_v30, %v1173_v24 }
 0x630   :  { %v1067_v26 = vadd.f32 %v1306_v3, %v1066_v39 }
 0x632   :  { %v2091_v41 = vadd.f32 %v1067_v26, %v983_v8 }
 0x634   :  { %v1081_v45 = vsel %vm189_vm0, %v2091_v41, 0.0  ;;  %v1089_v42 = vmul.f32 %v2091_v41, %v2091_v41 }
 0x635   :  { %1082 = vadd.xlane.f32.xlu0 %v1081_v45 }
 0x636   :  { %v1097_v47 = vsel %vm189_vm0, %v1089_v42, 0.0 }
 0x637   :  { %v1068_v21 = vpop.f32.mrf.mxu2 }
 0x638   :  { %v1069_v51 = vadd.f32 %v1306_v3, %v1068_v21 }
 0x63a   :  { %v2097_v12 = vadd.f32 %v1069_v51, %v984_v57 }
 0x63c   :  { %v1084_v48 = vsel %vm189_vm0, %v2097_v12, 0.0  ;;  %v1090_v49 = vmul.f32 %v2097_v12, %v2097_v12 }
 0x63d   :  { %1098 = vadd.xlane.f32.xlu0 %v1097_v47  ;;  %1085 = vadd.xlane.f32.xlu2 %v1084_v48 }
 0x63e   :  { %v1100_v32 = vsel %vm189_vm0, %v1090_v49, 0.0 }
 0x63f   :  { %1101 = vadd.xlane.f32.xlu1 %v1100_v32 }
 0x645   :  { %1095 = vadd.xlane.f32.xlu2 %v1094_v50 }
 0x658   :  { %1160 = vperm.xlu1 %1299, %v2033_v28  }
 0x698   :  { %v1077_v13 = vpop.xlane.xlu2 %1076 }
 0x69a   :  { %v1093_v27 = vpop.xlane.xlu1 %1092 }
 0x6a2   :  { %v1080_v56 = vpop.xlane.xlu1 %1079 }
 0x6a8   :  { %v1083_v52 = vpop.xlane.xlu0 %1082 }
 0x6a9   :  { %v1103_v55 = vadd.f32 %v1083_v52, %v1077_v13 }
 0x6ab   :  { %v1105_v59 = vmul.f32 0.015625, %v1103_v55 }
 0x6ad   :  { %v1111_v9 = vmul.f32 %v1105_v59, %v1105_v59  ;;  %v1141_v26 = vsub.f32 %v2080_v17, %v1105_v59  ;;  %v1143_v45 = vsub.f32 %v2091_v41, %v1105_v59  ;;  %v1307_v17 = vld [vmem:[#allocation13] ss:$0 sm:$0xff] }
 0x6b0   :  { %v1099_v43 = vpop.xlane.xlu0 %1098  ;;  %v1086_v36 = vpop.xlane.xlu2 %1085 }
 0x6b1   :  { %v1107_v57 = vadd.f32 %v1099_v43, %v1093_v27  ;;  %v1104_v44 = vadd.f32 %v1086_v36, %v1080_v56 }
 0x6b2   :  { %v1102_v2 = vpop.xlane.xlu1 %1101 }
 0x6b3   :  { %v1109_v8 = vmul.f32 0.015625, %v1107_v57  ;;  %v1106_v60 = vmul.f32 0.015625, %v1104_v44 }
 0x6b5   :  { %v1113_v15 = vsub.f32 %v1109_v8, %v1111_v9  ;;  %v1112_v58 = vmul.f32 %v1106_v60, %v1106_v60 }
 0x6b7   :  { %v1115_v35 = vmax.f32 %v1113_v15, 0.0 }
 0x6b8   :  { %v1096_v61 = vpop.xlane.xlu2 %1095 }
 0x6b9   :  { %v1117_v62 = vadd.f32 1e-05, %v1115_v35  ;;  %v1108_v46 = vadd.f32 %v1102_v2, %v1096_v61 }
 0x6bb   :  { %1328 = vrsqrt.f32 %v1117_v62  ;;  %v1110_v63 = vmul.f32 0.015625, %v1108_v46  ;;  %vm1125_vm5 = vweird.f32 %v1117_v62 }
 0x6bd   :  { %v1114_v22 = vsub.f32 %v1110_v63, %v1112_v58 }
 0x6bf   :  { %v1116_v37 = vmax.f32 %v1114_v22, 0.0 }
 0x6c1   :  { %v1329_v54 = vpop.eup %1328  ;;  %v1118_v11 = vadd.f32 1e-05, %v1116_v37 }
 0x6c2   :  { %v1120_v0 = vmul.f32 %v1329_v54, %v1117_v62  ;;  %vm1126_vm11 = vweird.f32 %v1329_v54 }
 0x6c3   :  { %1330 = vrsqrt.f32 %v1118_v11  ;;  %vm1127_vm12 = vmor %vm1125_vm5, %vm1126_vm11  ;;  %vm1135_vm14 = vweird.f32 %v1118_v11 }
 0x6c4   :  { %v1121_v4 = vmul.f32 %v1329_v54, %v1120_v0 }
 0x6c6   :  { %v1122_v5 = vmul.f32 0.5, %v1121_v4 }
 0x6c8   :  { %v1123_v6 = vsub.f32 1.5, %v1122_v5 }
 0x6c9   :  { %v1331_v25 = vpop.eup %1330 }
 0x6ca   :  { %v1130_v34 = vmul.f32 %v1331_v25, %v1118_v11  ;;  %v1124_v40 = vmul.f32 %v1329_v54, %v1123_v6  ;;  %vm1136_vm13 = vweird.f32 %v1331_v25  ;;  %v1161_v42 = vpop.permute.xlu1 %1160 }
 0x6cb   :  { %vm1137_vm8 = vmor %vm1135_vm14, %vm1136_vm13 }
 0x6cc   :  { %v1131_v20 = vmul.f32 %v1331_v25, %v1130_v34  ;;  %v1128_v7 = vsel %vm1127_vm12, %v1329_v54, %v1124_v40 }
 0x6cd   :  { %v1139_v29 = vmul.f32 %v1128_v7, %v2033_v28  ;;  %v1178_v28 = vpack.c.bf16 %v1176_v23, %v1175_v19 }
 0x6ce   :  { %v1132_v53 = vmul.f32 0.5, %v1131_v20 }
 0x6cf   :  { %1147 = vperm.xlu2 %1297, %v1139_v29   ;;  %1195 = vmatpush.bf16.msra.mxu3 %v1178_v28 }
 0x6d0   :  { %v1133_v3 = vsub.f32 1.5, %v1132_v53 }
 0x6d2   :  { %v1134_v14 = vmul.f32 %v1331_v25, %v1133_v3 }
 0x6d3   :  { %1196 = vmatpush.bf16.msra.mxu3 %v1177_v1 }
 0x6d4   :  { %v1138_v16 = vsel %vm1137_vm8, %v1331_v25, %v1134_v14 }
 0x6d5   :  { %v1140_v18 = vmul.f32 %v1138_v16, %v2049_v31 }
 0x6d7   :  { %1152 = vperm.xlu0 %1298, %v1140_v18   ;;  %1300 = vset.pattern.permute.xlu2 %v1552_v10 }
 0x6d8   :  { %1164 = vperm.xlu2 %1300, %v2049_v31   ;;  %v1142_v31 = vsub.f32 %v2087_v38, %v1106_v60 }
 0x6df   :  { %1301 = vset.pattern.permute.xlu0 %v1552_v10  ;;  %v1144_v10 = vsub.f32 %v2097_v12, %v1106_v60 }
 0x729   :  { %v1148_v39 = vpop.permute.xlu2 %1147 }
 0x72a   :  { %v1155_v21 = vmul.f32 %v1148_v39, %v1141_v26  ;;  %v1157_v51 = vmul.f32 %v1148_v39, %v1143_v45 }
 0x72c   :  { %v1167_v33 = vadd.f32 %v1161_v42, %v1155_v21  ;;  %v1169_v50 = vadd.f32 %v1161_v42, %v1157_v51 }
 0x732   :  { %v1165_v48 = vpop.permute.xlu2 %1164 }
 0x749   :  { %v1153_v47 = vpop.permute.xlu0 %1152 }
 0x74a   :  { %v1156_v49 = vmul.f32 %v1153_v47, %v1142_v31  ;;  %v1158_v32 = vmul.f32 %v1153_v47, %v1144_v10 }
 0x74c   :  { %v1168_v27 = vadd.f32 %v1165_v48, %v1156_v49  ;;  %v1170_v13 = vadd.f32 %v1165_v48, %v1158_v32 }
 0x74e   :  { %v1171_v52 = vpack.c.bf16 %v1168_v27, %v1167_v33  ;;  %v1172_v55 = vpack.c.bf16 %v1170_v13, %v1169_v50 }
 0x750   :  { %1243 = vmatmul.msk.bf16.vlgmr.msra.gmra.mxu3 %vm189_vm0, %v1171_v52 }
 0x760   :  { %1244 = vmatmul.msk.bf16.gmra.mxu3 %vm189_vm0, %v1172_v55 }
 0x7d3   :  { %v1198_v41 = vpop.f32.mrf.mxu3 }
 0x7d4   :  { %v1199_v56 = vadd.f32 %v1307_v17, %v1198_v41 }
 0x7d6   :  { %1208 = vst.msk [vmem:[%s2152_s16] sm:$0xff] %vm189_vm0, %v1199_v56 }
 0x7db   :  { %v1200_v38 = vpop.f32.mrf.mxu3 }
 0x7dc   :  { %v1201_v12 = vadd.f32 %v1307_v17, %v1200_v38 }
 0x7de   :  { %1209 = vst.msk [vmem:[%s2152_s16 + $0x8] sm:$0xff] %vm189_vm0, %v1201_v12 }
 0x7e3   :  { %v1203_v59 = vpop.f32.mrf.mxu3 }
 0x7e4   :  { %v1204_v43 = vadd.f32 %v1307_v17, %v1203_v59 }
 0x7e6   :  { %1210 = vst.msk [vmem:[%s2152_s16 + $0x10] sm:$0xff] %vm189_vm0, %v1204_v43 }
 0x7eb   :  { %v1205_v36 = vpop.f32.mrf.mxu3 }
 0x7ec   :  { %v1206_v57 = vadd.f32 %v1307_v17, %v1205_v36 }
 0x7ee   :  { %1211 = vst.msk [vmem:[%s2152_s16 + $0x18] sm:$0xff] %vm189_vm0, %v1206_v57 }
 0x7ef   :  { %1216 = vsyncpa [#allocation3], 1 }
 0x7f0   :  { %1217 = vsyncpa [#allocation5], 1 }
 0x7f1   :  { %1218 = vsyncpa [#allocation8], 1 }
 0x7f2   :  { %1219 = vsyncpa [#allocation11], 1 }
 0x7f3   :  { %1220 = vsyncpa [#allocation14], 1 }

</bundles_post_ra>
